<compile_context>
chip_gen: v6e
topology: v6e:2x2x1
jax: 0.10.0
libtpu: 0.0.40
codegen_flags: <defaults>
</compile_context>

<pallas_src>
import numpy as np
import jax
import jax.numpy as jnp
from jax import lax
from jax.experimental import pallas as pl
from jax.experimental.pallas import tpu as pltpu


# f32 matmul operands keep the correctness check tight at this toy size.  At
# production sizes flip to jnp.bfloat16 (operands only -- accumulation stays
# f32 via preferred_element_type) once the MXU shows up on the critical path;
# at Cout<=32 the kernel is store/XLU-bound, not MXU-bound (review #7 / v6e).
_MATMUL_DTYPE = jnp.float32

_SUBLANE = 8  # f32 sublane tile


def _round_up(v, m):
    return (v + m - 1) // m * m


def _shift_hw(x, off):
    """shifted[..., j] = x[..., (j + off) mod HW]  (static off).

    Lane-axis rotation: lowers to XLU lane rotates / concat-of-lane-slices,
    keeping traffic off the (otherwise saturated) vector load/store slots.
    Wrapped values are either masked by the caller (conv halo) or never
    selected (pool compaction), so the mod wrap is harmless.
    """
    hw = x.shape[-1]
    s = (-off) % hw
    if s == 0:
        return x
    return jnp.roll(x, s, axis=-1)


def _conv3x3_same_cm(x, wb, h, w):
    """3x3 / stride-1 / SAME conv in channel-major layout.

    x  : (Cin_pad, H*W) f32 activation (channels on sublanes, flat spatial on lanes).
    wb : (Cout, 9*Cin_pad + 1) packed weights; the LAST column is the bias,
         folded into the single matmul via a ones-row in the patch.
    Returns the pre-ReLU (Cout, H*W) f32 output.
    """
    hw = h * w
    assert w & (w - 1) == 0, "W must be a power of two"
    # TODO(synk): general (non power-of-two) W needs a lane-index modulus here.
    lane = lax.broadcasted_iota(jnp.int32, (1, hw), 1)   # flat spatial index
    col = jnp.bitwise_and(lane, w - 1)                   # w coordinate (w = 2^k)

    taps = []
    for dy in range(3):
        for dx in range(3):
            off = (dy - 1) * w + (dx - 1)
            t = _shift_hw(x, off)
            conds = []
            if dy == 0:
                conds.append(lane >= w)          # source row h-1 exists
            if dy == 2:
                conds.append(lane < hw - w)      # source row h+1 exists
            if dx == 0:
                conds.append(col >= 1)           # source col w-1 exists
            if dx == 2:
                conds.append(col < w - 1)        # source col w+1 exists
            if conds:
                m = conds[0]
                for extra in conds[1:]:
                    m = jnp.logical_and(m, extra)
                t = jnp.where(m, t, 0.0)
            taps.append(t)
    taps.append(jnp.ones((1, hw), x.dtype))      # ones row -> bias folded into matmul
    patch = jnp.concatenate(taps, axis=0)        # (9*Cin_pad + 1, H*W)

    return jnp.dot(wb.astype(_MATMUL_DTYPE), patch.astype(_MATMUL_DTYPE),
                   preferred_element_type=jnp.float32)   # (Cout, H*W)


def _maxpool_2x2_cm(x, h, w):
    """2x2 / stride-2 max-pool in channel-major layout.

    Two lane-roll pair-maxes (XLU + VPU) followed by one MXU matmul with a
    constant 0/1 selection matrix for the stride-2 lane compaction.  Rolled
    wrap values land only at odd rows/cols, which the selection matrix never
    picks, so no masks are needed.
    """
    hw = h * w
    m = jnp.maximum(x, _shift_hw(x, 1))      # max over w pairs (valid at even w)
    m = jnp.maximum(m, _shift_hw(m, w))      # max over h pairs (valid at even h)

    w2 = w // 2
    hw4 = hw // 4
    assert w2 & (w2 - 1) == 0
    rows = lax.broadcasted_iota(jnp.int32, (hw, hw4), 0)
    cols = lax.broadcasted_iota(jnp.int32, (hw, hw4), 1)
    h2 = jnp.right_shift(cols, int(np.log2(w2))) if w2 > 1 else cols   # cols // w2
    c2 = jnp.bitwise_and(cols, w2 - 1)                                 # cols %  w2
    sel = (rows == 2 * h2 * w + 2 * c2).astype(x.dtype)                # (H*W, H*W/4)

    return jnp.dot(m.astype(_MATMUL_DTYPE), sel.astype(_MATMUL_DTYPE),
                   preferred_element_type=jnp.float32)                 # (C, H*W/4)


# ----------------------------------------------------------------------------
# NeuralStyleNet (Pallas) -- whole forward pass in ONE pallas_call
# ----------------------------------------------------------------------------

class NeuralStyleNetPallas:
    """Mirror of the PyTorch NeuralStyleNet.forward loop.

    `features` is a list of layer descriptors:
      ("conv", w(3,3,Cin,Cout), b(Cout,)) | ("relu",) | ("pool",)
    Conv outputs are captured PRE-ReLU (as in the reference), returned in NCHW.
    """

    def __init__(self, features,
                 content_layers=('conv_4',),
                 style_layers=('conv_1', 'conv_2', 'conv_3', 'conv_4', 'conv_5')):
        self.features = list(features)
        self.content_layers = tuple(content_layers)
        self.style_layers = tuple(style_layers)

    def __call__(self, x_nchw):
        capture = set(self.content_layers) | set(self.style_layers)

        x = jnp.asarray(x_nchw, jnp.float32)
        N, C, H, W = x.shape
        c_pad0 = _round_up(C, _SUBLANE)
        x_cm = x.reshape(N, C, H * W)                   # NCHW -> channel-major, no transpose
        if c_pad0 != C:
            # Zero-pad input channels to a sublane multiple so every im2col
            # concat offset is 8-aligned (padded weight rows are zero too).
            x_cm = jnp.pad(x_cm, ((0, 0), (0, c_pad0 - C), (0, 0)))

        # ---- static pre-pass: layer plan, capture shapes, packed weights ----
        plan = []        # (kind, conv_idx|None, name, (h, w)) in forward order
        cap_order = []   # (name, (c, h, w)) in forward order
        conv_wb = []     # (Cout, 9*Cin_pad + 1) packed weight+bias per conv
        h, w, c, cp = H, W, C, c_pad0
        i = 0
        for layer in self.features:
            kind = layer[0]
            if kind == 'conv':
                _, wgt, bias = layer
                assert tuple(wgt.shape[:3]) == (3, 3, c), 'channel mismatch'
                cout = int(wgt.shape[-1])
                wgt = jnp.asarray(wgt, jnp.float32)
                if cp != c:
                    wgt = jnp.pad(wgt, ((0, 0), (0, 0), (0, cp - c), (0, 0)))
                w_r = wgt.reshape(9 * cp, cout).T                        # (Cout, 9*Cin_pad)
                b_col = jnp.asarray(bias, jnp.float32).reshape(cout, 1)
                conv_wb.append(jnp.concatenate([w_r, b_col], axis=1))    # bias folded
                c = cout
                cp = cout   # Cout here is always a sublane multiple (8/16/32)
                i += 1
                name = 'conv_' + str(i)
                plan.append(('conv', len(conv_wb) - 1, name, (h, w)))
            elif kind == 'relu':
                name = 'relu_' + str(i)
                plan.append(('relu', None, name, (h, w)))
            elif kind == 'pool':
                assert h % 2 == 0 and w % 2 == 0, 'pool needs even H, W'
                # TODO(synk): odd sizes need reduce_window-style edge truncation.
                name = 'pool_' + str(i)
                plan.append(('pool', None, name, (h, w)))
                h, w = h // 2, w // 2
            else:
                raise ValueError('unknown layer kind: %r' % (kind,))
            if name in capture:
                cap_order.append((name, (c, h, w)))

        if not cap_order:
            return {'content': {}, 'style': {}}

        # Drop trailing layers whose output is never captured (e.g. final ReLU).
        last = max(k for k, e in enumerate(plan) if e[2] in capture)
        plan = plan[:last + 1]
        n_conv = 1 + max((e[1] for e in plan if e[0] == 'conv'), default=-1)
        conv_wb = conv_wb[:n_conv]
        n_cap = len(cap_order)

        # ---- fused kernel: all layers for one batch element per grid step ----
        def kernel(*refs):
            x_ref = refs[0]
            wb_refs = refs[1:1 + n_conv]
            cap_refs = refs[1 + n_conv:]

            act = x_ref[0]                  # (Cin_pad, H*W) channel-major plane
            cap_i = 0
            for kind, ci, name, (hh, ww) in plan:
                if kind == 'conv':
                    act = _conv3x3_same_cm(act, wb_refs[ci][...], hh, ww)
                elif kind == 'relu':
                    act = jnp.maximum(act, 0.0)   # fused; conv captures stay pre-ReLU
                else:  # pool
                    act = _maxpool_2x2_cm(act, hh, ww)
                if name in capture:
                    cap_refs[cap_i][0] = act.astype(cap_refs[cap_i].dtype)
                    cap_i += 1

        in_specs = [pl.BlockSpec((1, c_pad0, H * W), lambda n: (n, 0, 0))]
        args = [x_cm]
        for wb in conv_wb:
            in_specs.append(pl.BlockSpec(tuple(wb.shape), lambda n: (0, 0)))
            args.append(wb)

        out_specs = tuple(pl.BlockSpec((1, cc, hh * ww), lambda n: (n, 0, 0))
                          for _, (cc, hh, ww) in cap_order)
        out_shape = tuple(jax.ShapeDtypeStruct((N, cc, hh * ww), jnp.float32)
                          for _, (cc, hh, ww) in cap_order)

        # TODO(synk): at production image sizes, add a spatial (row-block) grid
        # axis with a 1-row halo so the per-step working set fits v7x's 64 MiB
        # VMEM, and fold the batch into the matmul lanes on 1-TC chips (v5e/v6e).
        outs = pl.pallas_call(
            kernel,
            out_shape=out_shape,
            grid=(N,),
            in_specs=in_specs,
            out_specs=out_specs,
            compiler_params=pltpu.CompilerParams(
                dimension_semantics=("parallel",)),   # v7x: batch over 2 TCs
        )(*args)
        if not isinstance(outs, (list, tuple)):
            outs = (outs,)

        # Channel-major (N, C, H*W) -> NCHW is a pure reshape (no transpose).
        captured = {name: o.reshape(N, cc, hh, ww)
                    for (name, (cc, hh, ww)), o in zip(cap_order, outs)}
        content = {n: captured[n] for n in self.content_layers if n in captured}
        style = {n: captured[n] for n in self.style_layers if n in captured}
        return {'content': content, 'style': style}


# ----------------------------------------------------------------------------
# Deterministic parameter construction + pure-JAX reference
# ----------------------------------------------------------------------------

_ARCH = ["conv", "relu", "conv", "relu", "pool",
         "conv", "relu", "conv", "relu", "pool",
         "conv", "relu"]
_CHANNEL_PLAN = ((3, 8), (8, 8), (8, 16), (16, 16), (16, 32))


def make_features(key):
    feats = []
    conv_idx = 0
    keys = jax.random.split(key, 2 * len(_CHANNEL_PLAN))
    for op in _ARCH:
        if op == "conv":
            cin, cout = _CHANNEL_PLAN[conv_idx]
            kw, kb = keys[2 * conv_idx], keys[2 * conv_idx + 1]
            w = jax.random.normal(kw, (3, 3, cin, cout), jnp.float32) / jnp.sqrt(9.0 * cin)
            b = 0.05 * jax.random.normal(kb, (cout,), jnp.float32)
            feats.append(("conv", w, b))
            conv_idx += 1
        else:
            feats.append((op,))
    return feats


def ref_forward(x_nchw, features,
                content_layers=('conv_4',),
                style_layers=('conv_1', 'conv_2', 'conv_3', 'conv_4', 'conv_5')):
    x = jnp.transpose(x_nchw, (0, 2, 3, 1))
    i = 0
    content, style = {}, {}
    for layer in features:
        if layer[0] == "conv":
            _, w, b = layer
            x = jax.lax.conv_general_dilated(
                x, w, window_strides=(1, 1), padding="SAME",
                dimension_numbers=("NHWC", "HWIO", "NHWC")) + b
            i += 1
            name = 'conv_' + str(i)
        elif layer[0] == "relu":
            x = jnp.maximum(x, 0.0)
            name = 'relu_' + str(i)
        else:
            x = jax.lax.reduce_window(x, -jnp.inf, jax.lax.max,
                                      (1, 2, 2, 1), (1, 2, 2, 1), "VALID")
            name = 'pool_' + str(i)
        if name in content_layers:
            content[name] = jnp.transpose(x, (0, 3, 1, 2))
        if name in style_layers:
            style[name] = jnp.transpose(x, (0, 3, 1, 2))
    return {'content': content, 'style': style}


# ----------------------------------------------------------------------------
# Main
# ----------------------------------------------------------------------------

if __name__ == "__main__":
    key = jax.random.PRNGKey(0)
    kx, kp = jax.random.split(key)

    # Small PyTorch-style input: NCHW, 3 "RGB" channels, 16x16 spatial.
    x = jax.random.normal(kx, (2, 3, 16, 16), jnp.float32)

    features = make_features(kp)
    net = NeuralStyleNetPallas(features)

    out = net(x)
    out = jax.block_until_ready(out)

    # Correctness check against a pure-JAX reference (loose tolerance: the MXU
    # f32 matmul path may use reduced-precision passes vs XLA's conv).
    ref = ref_forward(x, features)
    for grp in ('style', 'content'):
        for name, arr in out[grp].items():
            np.testing.assert_allclose(np.asarray(arr), np.asarray(ref[grp][name]),
                                       rtol=5e-2, atol=5e-2)

    # Sanity on expected shapes (NCHW, matching the PyTorch module).
    assert out['content']['conv_4'].shape == (2, 16, 8, 8)
    assert out['style']['conv_5'].shape == (2, 32, 4, 4)

    print("KERNEL_OK")
</pallas_src>

<mosaic_0001>
module attributes {stable_mosaic.version = 11 : i64} {
  func.func @kernel(%arg0: i32, %arg1: memref<1x8x256xf32, #tpu.memory_space<vmem>>, %arg2: memref<8x73xf32, #tpu.memory_space<vmem>>, %arg3: memref<8x73xf32, #tpu.memory_space<vmem>>, %arg4: memref<16x73xf32, #tpu.memory_space<vmem>>, %arg5: memref<16x145xf32, #tpu.memory_space<vmem>>, %arg6: memref<32x145xf32, #tpu.memory_space<vmem>>, %arg7: memref<1x8x256xf32, #tpu.memory_space<vmem>>, %arg8: memref<1x8x256xf32, #tpu.memory_space<vmem>>, %arg9: memref<1x16x64xf32, #tpu.memory_space<vmem>>, %arg10: memref<1x16x64xf32, #tpu.memory_space<vmem>>, %arg11: memref<1x32x16xf32, #tpu.memory_space<vmem>>) attributes {dimension_semantics = [#tpu.dimension_semantics<parallel>], iteration_bounds = array<i64: 2>, scalar_prefetch = 0 : i64, scratch_operands = 0 : i64, tpu.core_type = #tpu.core_type<tc>, window_params = [{transform_indices = @transform_0, window_bounds = array<i64: 1, 8, 256>}, {pipeline_mode = #tpu.pipeline_mode<synchronous>, transform_indices = @transform_1, window_bounds = array<i64: 8, 73>}, {pipeline_mode = #tpu.pipeline_mode<synchronous>, transform_indices = @transform_2, window_bounds = array<i64: 8, 73>}, {pipeline_mode = #tpu.pipeline_mode<synchronous>, transform_indices = @transform_3, window_bounds = array<i64: 16, 73>}, {pipeline_mode = #tpu.pipeline_mode<synchronous>, transform_indices = @transform_4, window_bounds = array<i64: 16, 145>}, {pipeline_mode = #tpu.pipeline_mode<synchronous>, transform_indices = @transform_5, window_bounds = array<i64: 32, 145>}, {transform_indices = @transform_6, window_bounds = array<i64: 1, 8, 256>}, {transform_indices = @transform_7, window_bounds = array<i64: 1, 8, 256>}, {transform_indices = @transform_8, window_bounds = array<i64: 1, 16, 64>}, {transform_indices = @transform_9, window_bounds = array<i64: 1, 16, 64>}, {transform_indices = @transform_10, window_bounds = array<i64: 1, 32, 16>}]} {
    %c0 = arith.constant 0 : index
    %c0_0 = arith.constant 0 : index
    %c0_1 = arith.constant 0 : index
    %0 = vector.load %arg1[%c0, %c0_0, %c0_1] : memref<1x8x256xf32, #tpu.memory_space<vmem>>, vector<1x8x256xf32>
    %1 = vector.shape_cast %0 : vector<1x8x256xf32> to vector<8x256xf32>
    %c0_2 = arith.constant 0 : index
    %c0_3 = arith.constant 0 : index
    %2 = vector.load %arg2[%c0_2, %c0_3] : memref<8x73xf32, #tpu.memory_space<vmem>>, vector<8x73xf32>
    %3 = tpu.iota {dimensions = array<i32: 1>} : vector<1x256xi32>
    %c15_i32 = arith.constant 15 : i32
    %4 = vector.broadcast %c15_i32 : i32 to vector<1x256xi32>
    %5 = arith.andi %3, %4 : vector<1x256xi32>
    %6 = vector.extract_strided_slice %1 {offsets = [0, 239], sizes = [8, 17], strides = [1, 1]} : vector<8x256xf32> to vector<8x17xf32>
    %7 = vector.extract_strided_slice %1 {offsets = [0, 0], sizes = [8, 239], strides = [1, 1]} : vector<8x256xf32> to vector<8x239xf32>
    %8 = tpu.concatenate %6, %7 in 1 : vector<8x17xf32>, vector<8x239xf32> -> vector<8x256xf32>
    %c16_i32 = arith.constant 16 : i32
    %9 = vector.broadcast %c16_i32 : i32 to vector<1x256xi32>
    %10 = arith.cmpi sge, %3, %9 : vector<1x256xi32>
    %c1_i32 = arith.constant 1 : i32
    %11 = vector.broadcast %c1_i32 : i32 to vector<1x256xi32>
    %12 = arith.cmpi sge, %5, %11 : vector<1x256xi32>
    %13 = arith.andi %10, %12 : vector<1x256xi1>
    %cst = arith.constant 0.000000e+00 : f32
    %14 = vector.shape_cast %13 : vector<1x256xi1> to vector<1x256xi1>
    %15 = vector.broadcast %14 : vector<1x256xi1> to vector<8x256xi1>
    %16 = vector.broadcast %cst : f32 to vector<8x256xf32>
    %17 = arith.select %15, %8, %16 : vector<8x256xi1>, vector<8x256xf32>
    %18 = vector.extract_strided_slice %1 {offsets = [0, 240], sizes = [8, 16], strides = [1, 1]} : vector<8x256xf32> to vector<8x16xf32>
    %19 = vector.extract_strided_slice %1 {offsets = [0, 0], sizes = [8, 240], strides = [1, 1]} : vector<8x256xf32> to vector<8x240xf32>
    %20 = tpu.concatenate %18, %19 in 1 : vector<8x16xf32>, vector<8x240xf32> -> vector<8x256xf32>
    %c16_i32_4 = arith.constant 16 : i32
    %21 = vector.broadcast %c16_i32_4 : i32 to vector<1x256xi32>
    %22 = arith.cmpi sge, %3, %21 : vector<1x256xi32>
    %cst_5 = arith.constant 0.000000e+00 : f32
    %23 = vector.shape_cast %22 : vector<1x256xi1> to vector<1x256xi1>
    %24 = vector.broadcast %23 : vector<1x256xi1> to vector<8x256xi1>
    %25 = vector.broadcast %cst_5 : f32 to vector<8x256xf32>
    %26 = arith.select %24, %20, %25 : vector<8x256xi1>, vector<8x256xf32>
    %27 = vector.extract_strided_slice %1 {offsets = [0, 241], sizes = [8, 15], strides = [1, 1]} : vector<8x256xf32> to vector<8x15xf32>
    %28 = vector.extract_strided_slice %1 {offsets = [0, 0], sizes = [8, 241], strides = [1, 1]} : vector<8x256xf32> to vector<8x241xf32>
    %29 = tpu.concatenate %27, %28 in 1 : vector<8x15xf32>, vector<8x241xf32> -> vector<8x256xf32>
    %c16_i32_6 = arith.constant 16 : i32
    %30 = vector.broadcast %c16_i32_6 : i32 to vector<1x256xi32>
    %31 = arith.cmpi sge, %3, %30 : vector<1x256xi32>
    %c15_i32_7 = arith.constant 15 : i32
    %32 = vector.broadcast %c15_i32_7 : i32 to vector<1x256xi32>
    %33 = arith.cmpi slt, %5, %32 : vector<1x256xi32>
    %34 = arith.andi %31, %33 : vector<1x256xi1>
    %cst_8 = arith.constant 0.000000e+00 : f32
    %35 = vector.shape_cast %34 : vector<1x256xi1> to vector<1x256xi1>
    %36 = vector.broadcast %35 : vector<1x256xi1> to vector<8x256xi1>
    %37 = vector.broadcast %cst_8 : f32 to vector<8x256xf32>
    %38 = arith.select %36, %29, %37 : vector<8x256xi1>, vector<8x256xf32>
    %39 = vector.extract_strided_slice %1 {offsets = [0, 255], sizes = [8, 1], strides = [1, 1]} : vector<8x256xf32> to vector<8x1xf32>
    %40 = vector.extract_strided_slice %1 {offsets = [0, 0], sizes = [8, 255], strides = [1, 1]} : vector<8x256xf32> to vector<8x255xf32>
    %41 = tpu.concatenate %39, %40 in 1 : vector<8x1xf32>, vector<8x255xf32> -> vector<8x256xf32>
    %c1_i32_9 = arith.constant 1 : i32
    %42 = vector.broadcast %c1_i32_9 : i32 to vector<1x256xi32>
    %43 = arith.cmpi sge, %5, %42 : vector<1x256xi32>
    %cst_10 = arith.constant 0.000000e+00 : f32
    %44 = vector.shape_cast %43 : vector<1x256xi1> to vector<1x256xi1>
    %45 = vector.broadcast %44 : vector<1x256xi1> to vector<8x256xi1>
    %46 = vector.broadcast %cst_10 : f32 to vector<8x256xf32>
    %47 = arith.select %45, %41, %46 : vector<8x256xi1>, vector<8x256xf32>
    %48 = vector.extract_strided_slice %1 {offsets = [0, 1], sizes = [8, 255], strides = [1, 1]} : vector<8x256xf32> to vector<8x255xf32>
    %49 = vector.extract_strided_slice %1 {offsets = [0, 0], sizes = [8, 1], strides = [1, 1]} : vector<8x256xf32> to vector<8x1xf32>
    %50 = tpu.concatenate %48, %49 in 1 : vector<8x255xf32>, vector<8x1xf32> -> vector<8x256xf32>
    %c15_i32_11 = arith.constant 15 : i32
    %51 = vector.broadcast %c15_i32_11 : i32 to vector<1x256xi32>
    %52 = arith.cmpi slt, %5, %51 : vector<1x256xi32>
    %cst_12 = arith.constant 0.000000e+00 : f32
    %53 = vector.shape_cast %52 : vector<1x256xi1> to vector<1x256xi1>
    %54 = vector.broadcast %53 : vector<1x256xi1> to vector<8x256xi1>
    %55 = vector.broadcast %cst_12 : f32 to vector<8x256xf32>
    %56 = arith.select %54, %50, %55 : vector<8x256xi1>, vector<8x256xf32>
    %57 = vector.extract_strided_slice %1 {offsets = [0, 15], sizes = [8, 241], strides = [1, 1]} : vector<8x256xf32> to vector<8x241xf32>
    %58 = vector.extract_strided_slice %1 {offsets = [0, 0], sizes = [8, 15], strides = [1, 1]} : vector<8x256xf32> to vector<8x15xf32>
    %59 = tpu.concatenate %57, %58 in 1 : vector<8x241xf32>, vector<8x15xf32> -> vector<8x256xf32>
    %c240_i32 = arith.constant 240 : i32
    %60 = vector.broadcast %c240_i32 : i32 to vector<1x256xi32>
    %61 = arith.cmpi slt, %3, %60 : vector<1x256xi32>
    %c1_i32_13 = arith.constant 1 : i32
    %62 = vector.broadcast %c1_i32_13 : i32 to vector<1x256xi32>
    %63 = arith.cmpi sge, %5, %62 : vector<1x256xi32>
    %64 = arith.andi %61, %63 : vector<1x256xi1>
    %cst_14 = arith.constant 0.000000e+00 : f32
    %65 = vector.shape_cast %64 : vector<1x256xi1> to vector<1x256xi1>
    %66 = vector.broadcast %65 : vector<1x256xi1> to vector<8x256xi1>
    %67 = vector.broadcast %cst_14 : f32 to vector<8x256xf32>
    %68 = arith.select %66, %59, %67 : vector<8x256xi1>, vector<8x256xf32>
    %69 = vector.extract_strided_slice %1 {offsets = [0, 16], sizes = [8, 240], strides = [1, 1]} : vector<8x256xf32> to vector<8x240xf32>
    %70 = vector.extract_strided_slice %1 {offsets = [0, 0], sizes = [8, 16], strides = [1, 1]} : vector<8x256xf32> to vector<8x16xf32>
    %71 = tpu.concatenate %69, %70 in 1 : vector<8x240xf32>, vector<8x16xf32> -> vector<8x256xf32>
    %c240_i32_15 = arith.constant 240 : i32
    %72 = vector.broadcast %c240_i32_15 : i32 to vector<1x256xi32>
    %73 = arith.cmpi slt, %3, %72 : vector<1x256xi32>
    %cst_16 = arith.constant 0.000000e+00 : f32
    %74 = vector.shape_cast %73 : vector<1x256xi1> to vector<1x256xi1>
    %75 = vector.broadcast %74 : vector<1x256xi1> to vector<8x256xi1>
    %76 = vector.broadcast %cst_16 : f32 to vector<8x256xf32>
    %77 = arith.select %75, %71, %76 : vector<8x256xi1>, vector<8x256xf32>
    %78 = vector.extract_strided_slice %1 {offsets = [0, 17], sizes = [8, 239], strides = [1, 1]} : vector<8x256xf32> to vector<8x239xf32>
    %79 = vector.extract_strided_slice %1 {offsets = [0, 0], sizes = [8, 17], strides = [1, 1]} : vector<8x256xf32> to vector<8x17xf32>
    %80 = tpu.concatenate %78, %79 in 1 : vector<8x239xf32>, vector<8x17xf32> -> vector<8x256xf32>
    %c240_i32_17 = arith.constant 240 : i32
    %81 = vector.broadcast %c240_i32_17 : i32 to vector<1x256xi32>
    %82 = arith.cmpi slt, %3, %81 : vector<1x256xi32>
    %c15_i32_18 = arith.constant 15 : i32
    %83 = vector.broadcast %c15_i32_18 : i32 to vector<1x256xi32>
    %84 = arith.cmpi slt, %5, %83 : vector<1x256xi32>
    %85 = arith.andi %82, %84 : vector<1x256xi1>
    %cst_19 = arith.constant 0.000000e+00 : f32
    %86 = vector.shape_cast %85 : vector<1x256xi1> to vector<1x256xi1>
    %87 = vector.broadcast %86 : vector<1x256xi1> to vector<8x256xi1>
    %88 = vector.broadcast %cst_19 : f32 to vector<8x256xf32>
    %89 = arith.select %87, %80, %88 : vector<8x256xi1>, vector<8x256xf32>
    %cst_20 = arith.constant 1.000000e+00 : f32
    %90 = vector.broadcast %cst_20 : f32 to vector<1x256xf32>
    %91 = tpu.concatenate %17, %26, %38, %47, %1, %56, %68, %77, %89, %90 in 0 : vector<8x256xf32>, vector<8x256xf32>, vector<8x256xf32>, vector<8x256xf32>, vector<8x256xf32>, vector<8x256xf32>, vector<8x256xf32>, vector<8x256xf32>, vector<8x256xf32>, vector<1x256xf32> -> vector<73x256xf32>
    %cst_21 = arith.constant dense<0.000000e+00> : vector<8x256xf32>
    %92 = tpu.matmul %2, %91, %cst_21 {dimension_numbers = #tpu.dot_dimension_numbers<[1], [0], [0], [1], [0, 0, 1, 1], [], []>} : vector<8x73xf32>, vector<73x256xf32>, vector<8x256xf32> -> vector<8x256xf32>
    %c0_22 = arith.constant 0 : index
    %c0_23 = arith.constant 0 : index
    %c0_24 = arith.constant 0 : index
    %93 = vector.load %arg7[%c0_22, %c0_23, %c0_24] : memref<1x8x256xf32, #tpu.memory_space<vmem>>, vector<1x8x256xf32>
    %94 = vector.shape_cast %93 : vector<1x8x256xf32> to vector<8x256xf32>
    %95 = vector.shape_cast %92 : vector<8x256xf32> to vector<1x8x256xf32>
    tpu.vector_store %arg7[%c0_22, %c0_23, %c0_24], %95 {strides = array<i32>} : memref<1x8x256xf32, #tpu.memory_space<vmem>>, vector<1x8x256xf32>,
    %cst_25 = arith.constant 0.000000e+00 : f32
    %96 = vector.broadcast %cst_25 : f32 to vector<8x256xf32>
    %97 = arith.maximumf %92, %96 : vector<8x256xf32>
    %c0_26 = arith.constant 0 : index
    %c0_27 = arith.constant 0 : index
    %98 = vector.load %arg3[%c0_26, %c0_27] : memref<8x73xf32, #tpu.memory_space<vmem>>, vector<8x73xf32>
    %99 = tpu.iota {dimensions = array<i32: 1>} : vector<1x256xi32>
    %c15_i32_28 = arith.constant 15 : i32
    %100 = vector.broadcast %c15_i32_28 : i32 to vector<1x256xi32>
    %101 = arith.andi %99, %100 : vector<1x256xi32>
    %102 = vector.extract_strided_slice %97 {offsets = [0, 239], sizes = [8, 17], strides = [1, 1]} : vector<8x256xf32> to vector<8x17xf32>
    %103 = vector.extract_strided_slice %97 {offsets = [0, 0], sizes = [8, 239], strides = [1, 1]} : vector<8x256xf32> to vector<8x239xf32>
    %104 = tpu.concatenate %102, %103 in 1 : vector<8x17xf32>, vector<8x239xf32> -> vector<8x256xf32>
    %c16_i32_29 = arith.constant 16 : i32
    %105 = vector.broadcast %c16_i32_29 : i32 to vector<1x256xi32>
    %106 = arith.cmpi sge, %99, %105 : vector<1x256xi32>
    %c1_i32_30 = arith.constant 1 : i32
    %107 = vector.broadcast %c1_i32_30 : i32 to vector<1x256xi32>
    %108 = arith.cmpi sge, %101, %107 : vector<1x256xi32>
    %109 = arith.andi %106, %108 : vector<1x256xi1>
    %cst_31 = arith.constant 0.000000e+00 : f32
    %110 = vector.shape_cast %109 : vector<1x256xi1> to vector<1x256xi1>
    %111 = vector.broadcast %110 : vector<1x256xi1> to vector<8x256xi1>
    %112 = vector.broadcast %cst_31 : f32 to vector<8x256xf32>
    %113 = arith.select %111, %104, %112 : vector<8x256xi1>, vector<8x256xf32>
    %114 = vector.extract_strided_slice %97 {offsets = [0, 240], sizes = [8, 16], strides = [1, 1]} : vector<8x256xf32> to vector<8x16xf32>
    %115 = vector.extract_strided_slice %97 {offsets = [0, 0], sizes = [8, 240], strides = [1, 1]} : vector<8x256xf32> to vector<8x240xf32>
    %116 = tpu.concatenate %114, %115 in 1 : vector<8x16xf32>, vector<8x240xf32> -> vector<8x256xf32>
    %c16_i32_32 = arith.constant 16 : i32
    %117 = vector.broadcast %c16_i32_32 : i32 to vector<1x256xi32>
    %118 = arith.cmpi sge, %99, %117 : vector<1x256xi32>
    %cst_33 = arith.constant 0.000000e+00 : f32
    %119 = vector.shape_cast %118 : vector<1x256xi1> to vector<1x256xi1>
    %120 = vector.broadcast %119 : vector<1x256xi1> to vector<8x256xi1>
    %121 = vector.broadcast %cst_33 : f32 to vector<8x256xf32>
    %122 = arith.select %120, %116, %121 : vector<8x256xi1>, vector<8x256xf32>
    %123 = vector.extract_strided_slice %97 {offsets = [0, 241], sizes = [8, 15], strides = [1, 1]} : vector<8x256xf32> to vector<8x15xf32>
    %124 = vector.extract_strided_slice %97 {offsets = [0, 0], sizes = [8, 241], strides = [1, 1]} : vector<8x256xf32> to vector<8x241xf32>
    %125 = tpu.concatenate %123, %124 in 1 : vector<8x15xf32>, vector<8x241xf32> -> vector<8x256xf32>
    %c16_i32_34 = arith.constant 16 : i32
    %126 = vector.broadcast %c16_i32_34 : i32 to vector<1x256xi32>
    %127 = arith.cmpi sge, %99, %126 : vector<1x256xi32>
    %c15_i32_35 = arith.constant 15 : i32
    %128 = vector.broadcast %c15_i32_35 : i32 to vector<1x256xi32>
    %129 = arith.cmpi slt, %101, %128 : vector<1x256xi32>
    %130 = arith.andi %127, %129 : vector<1x256xi1>
    %cst_36 = arith.constant 0.000000e+00 : f32
    %131 = vector.shape_cast %130 : vector<1x256xi1> to vector<1x256xi1>
    %132 = vector.broadcast %131 : vector<1x256xi1> to vector<8x256xi1>
    %133 = vector.broadcast %cst_36 : f32 to vector<8x256xf32>
    %134 = arith.select %132, %125, %133 : vector<8x256xi1>, vector<8x256xf32>
    %135 = vector.extract_strided_slice %97 {offsets = [0, 255], sizes = [8, 1], strides = [1, 1]} : vector<8x256xf32> to vector<8x1xf32>
    %136 = vector.extract_strided_slice %97 {offsets = [0, 0], sizes = [8, 255], strides = [1, 1]} : vector<8x256xf32> to vector<8x255xf32>
    %137 = tpu.concatenate %135, %136 in 1 : vector<8x1xf32>, vector<8x255xf32> -> vector<8x256xf32>
    %c1_i32_37 = arith.constant 1 : i32
    %138 = vector.broadcast %c1_i32_37 : i32 to vector<1x256xi32>
    %139 = arith.cmpi sge, %101, %138 : vector<1x256xi32>
    %cst_38 = arith.constant 0.000000e+00 : f32
    %140 = vector.shape_cast %139 : vector<1x256xi1> to vector<1x256xi1>
    %141 = vector.broadcast %140 : vector<1x256xi1> to vector<8x256xi1>
    %142 = vector.broadcast %cst_38 : f32 to vector<8x256xf32>
    %143 = arith.select %141, %137, %142 : vector<8x256xi1>, vector<8x256xf32>
    %144 = vector.extract_strided_slice %97 {offsets = [0, 1], sizes = [8, 255], strides = [1, 1]} : vector<8x256xf32> to vector<8x255xf32>
    %145 = vector.extract_strided_slice %97 {offsets = [0, 0], sizes = [8, 1], strides = [1, 1]} : vector<8x256xf32> to vector<8x1xf32>
    %146 = tpu.concatenate %144, %145 in 1 : vector<8x255xf32>, vector<8x1xf32> -> vector<8x256xf32>
    %c15_i32_39 = arith.constant 15 : i32
    %147 = vector.broadcast %c15_i32_39 : i32 to vector<1x256xi32>
    %148 = arith.cmpi slt, %101, %147 : vector<1x256xi32>
    %cst_40 = arith.constant 0.000000e+00 : f32
    %149 = vector.shape_cast %148 : vector<1x256xi1> to vector<1x256xi1>
    %150 = vector.broadcast %149 : vector<1x256xi1> to vector<8x256xi1>
    %151 = vector.broadcast %cst_40 : f32 to vector<8x256xf32>
    %152 = arith.select %150, %146, %151 : vector<8x256xi1>, vector<8x256xf32>
    %153 = vector.extract_strided_slice %97 {offsets = [0, 15], sizes = [8, 241], strides = [1, 1]} : vector<8x256xf32> to vector<8x241xf32>
    %154 = vector.extract_strided_slice %97 {offsets = [0, 0], sizes = [8, 15], strides = [1, 1]} : vector<8x256xf32> to vector<8x15xf32>
    %155 = tpu.concatenate %153, %154 in 1 : vector<8x241xf32>, vector<8x15xf32> -> vector<8x256xf32>
    %c240_i32_41 = arith.constant 240 : i32
    %156 = vector.broadcast %c240_i32_41 : i32 to vector<1x256xi32>
    %157 = arith.cmpi slt, %99, %156 : vector<1x256xi32>
    %c1_i32_42 = arith.constant 1 : i32
    %158 = vector.broadcast %c1_i32_42 : i32 to vector<1x256xi32>
    %159 = arith.cmpi sge, %101, %158 : vector<1x256xi32>
    %160 = arith.andi %157, %159 : vector<1x256xi1>
    %cst_43 = arith.constant 0.000000e+00 : f32
    %161 = vector.shape_cast %160 : vector<1x256xi1> to vector<1x256xi1>
    %162 = vector.broadcast %161 : vector<1x256xi1> to vector<8x256xi1>
    %163 = vector.broadcast %cst_43 : f32 to vector<8x256xf32>
    %164 = arith.select %162, %155, %163 : vector<8x256xi1>, vector<8x256xf32>
    %165 = vector.extract_strided_slice %97 {offsets = [0, 16], sizes = [8, 240], strides = [1, 1]} : vector<8x256xf32> to vector<8x240xf32>
    %166 = vector.extract_strided_slice %97 {offsets = [0, 0], sizes = [8, 16], strides = [1, 1]} : vector<8x256xf32> to vector<8x16xf32>
    %167 = tpu.concatenate %165, %166 in 1 : vector<8x240xf32>, vector<8x16xf32> -> vector<8x256xf32>
    %c240_i32_44 = arith.constant 240 : i32
    %168 = vector.broadcast %c240_i32_44 : i32 to vector<1x256xi32>
    %169 = arith.cmpi slt, %99, %168 : vector<1x256xi32>
    %cst_45 = arith.constant 0.000000e+00 : f32
    %170 = vector.shape_cast %169 : vector<1x256xi1> to vector<1x256xi1>
    %171 = vector.broadcast %170 : vector<1x256xi1> to vector<8x256xi1>
    %172 = vector.broadcast %cst_45 : f32 to vector<8x256xf32>
    %173 = arith.select %171, %167, %172 : vector<8x256xi1>, vector<8x256xf32>
    %174 = vector.extract_strided_slice %97 {offsets = [0, 17], sizes = [8, 239], strides = [1, 1]} : vector<8x256xf32> to vector<8x239xf32>
    %175 = vector.extract_strided_slice %97 {offsets = [0, 0], sizes = [8, 17], strides = [1, 1]} : vector<8x256xf32> to vector<8x17xf32>
    %176 = tpu.concatenate %174, %175 in 1 : vector<8x239xf32>, vector<8x17xf32> -> vector<8x256xf32>
    %c240_i32_46 = arith.constant 240 : i32
    %177 = vector.broadcast %c240_i32_46 : i32 to vector<1x256xi32>
    %178 = arith.cmpi slt, %99, %177 : vector<1x256xi32>
    %c15_i32_47 = arith.constant 15 : i32
    %179 = vector.broadcast %c15_i32_47 : i32 to vector<1x256xi32>
    %180 = arith.cmpi slt, %101, %179 : vector<1x256xi32>
    %181 = arith.andi %178, %180 : vector<1x256xi1>
    %cst_48 = arith.constant 0.000000e+00 : f32
    %182 = vector.shape_cast %181 : vector<1x256xi1> to vector<1x256xi1>
    %183 = vector.broadcast %182 : vector<1x256xi1> to vector<8x256xi1>
    %184 = vector.broadcast %cst_48 : f32 to vector<8x256xf32>
    %185 = arith.select %183, %176, %184 : vector<8x256xi1>, vector<8x256xf32>
    %cst_49 = arith.constant 1.000000e+00 : f32
    %186 = vector.broadcast %cst_49 : f32 to vector<1x256xf32>
    %187 = tpu.concatenate %113, %122, %134, %143, %97, %152, %164, %173, %185, %186 in 0 : vector<8x256xf32>, vector<8x256xf32>, vector<8x256xf32>, vector<8x256xf32>, vector<8x256xf32>, vector<8x256xf32>, vector<8x256xf32>, vector<8x256xf32>, vector<8x256xf32>, vector<1x256xf32> -> vector<73x256xf32>
    %cst_50 = arith.constant dense<0.000000e+00> : vector<8x256xf32>
    %188 = tpu.matmul %98, %187, %cst_50 {dimension_numbers = #tpu.dot_dimension_numbers<[1], [0], [0], [1], [0, 0, 1, 1], [], []>} : vector<8x73xf32>, vector<73x256xf32>, vector<8x256xf32> -> vector<8x256xf32>
    %c0_51 = arith.constant 0 : index
    %c0_52 = arith.constant 0 : index
    %c0_53 = arith.constant 0 : index
    %189 = vector.load %arg8[%c0_51, %c0_52, %c0_53] : memref<1x8x256xf32, #tpu.memory_space<vmem>>, vector<1x8x256xf32>
    %190 = vector.shape_cast %189 : vector<1x8x256xf32> to vector<8x256xf32>
    %191 = vector.shape_cast %188 : vector<8x256xf32> to vector<1x8x256xf32>
    tpu.vector_store %arg8[%c0_51, %c0_52, %c0_53], %191 {strides = array<i32>} : memref<1x8x256xf32, #tpu.memory_space<vmem>>, vector<1x8x256xf32>,
    %cst_54 = arith.constant 0.000000e+00 : f32
    %192 = vector.broadcast %cst_54 : f32 to vector<8x256xf32>
    %193 = arith.maximumf %188, %192 : vector<8x256xf32>
    %194 = vector.extract_strided_slice %193 {offsets = [0, 1], sizes = [8, 255], strides = [1, 1]} : vector<8x256xf32> to vector<8x255xf32>
    %195 = vector.extract_strided_slice %193 {offsets = [0, 0], sizes = [8, 1], strides = [1, 1]} : vector<8x256xf32> to vector<8x1xf32>
    %196 = tpu.concatenate %194, %195 in 1 : vector<8x255xf32>, vector<8x1xf32> -> vector<8x256xf32>
    %197 = arith.maximumf %193, %196 : vector<8x256xf32>
    %198 = vector.extract_strided_slice %197 {offsets = [0, 16], sizes = [8, 240], strides = [1, 1]} : vector<8x256xf32> to vector<8x240xf32>
    %199 = vector.extract_strided_slice %197 {offsets = [0, 0], sizes = [8, 16], strides = [1, 1]} : vector<8x256xf32> to vector<8x16xf32>
    %200 = tpu.concatenate %198, %199 in 1 : vector<8x240xf32>, vector<8x16xf32> -> vector<8x256xf32>
    %201 = arith.maximumf %197, %200 : vector<8x256xf32>
    %202 = tpu.iota {dimensions = array<i32: 0>} : vector<256x64xi32>
    %203 = tpu.iota {dimensions = array<i32: 1>} : vector<256x64xi32>
    %c3_i32 = arith.constant 3 : i32
    %204 = vector.broadcast %c3_i32 : i32 to vector<256x64xi32>
    %205 = arith.shrsi %203, %204 : vector<256x64xi32>
    %c7_i32 = arith.constant 7 : i32
    %206 = vector.broadcast %c7_i32 : i32 to vector<256x64xi32>
    %207 = arith.andi %203, %206 : vector<256x64xi32>
    %c2_i32 = arith.constant 2 : i32
    %208 = vector.broadcast %c2_i32 : i32 to vector<256x64xi32>
    %209 = arith.muli %208, %205 : vector<256x64xi32>
    %c16_i32_55 = arith.constant 16 : i32
    %210 = vector.broadcast %c16_i32_55 : i32 to vector<256x64xi32>
    %211 = arith.muli %209, %210 : vector<256x64xi32>
    %c2_i32_56 = arith.constant 2 : i32
    %212 = vector.broadcast %c2_i32_56 : i32 to vector<256x64xi32>
    %213 = arith.muli %212, %207 : vector<256x64xi32>
    %214 = arith.addi %211, %213 : vector<256x64xi32>
    %215 = arith.cmpi eq, %202, %214 : vector<256x64xi32>
    %216 = arith.extui %215 : vector<256x64xi1> to vector<256x64xi32>
    %217 = arith.sitofp %216 : vector<256x64xi32> to vector<256x64xf32>
    %cst_57 = arith.constant dense<0.000000e+00> : vector<8x64xf32>
    %218 = tpu.matmul %201, %217, %cst_57 {dimension_numbers = #tpu.dot_dimension_numbers<[1], [0], [0], [1], [0, 0, 1, 1], [], []>} : vector<8x256xf32>, vector<256x64xf32>, vector<8x64xf32> -> vector<8x64xf32>
    %c0_58 = arith.constant 0 : index
    %c0_59 = arith.constant 0 : index
    %219 = vector.load %arg4[%c0_58, %c0_59] : memref<16x73xf32, #tpu.memory_space<vmem>>, vector<16x73xf32>
    %220 = tpu.iota {dimensions = array<i32: 1>} : vector<1x64xi32>
    %c7_i32_60 = arith.constant 7 : i32
    %221 = vector.broadcast %c7_i32_60 : i32 to vector<1x64xi32>
    %222 = arith.andi %220, %221 : vector<1x64xi32>
    %223 = vector.extract_strided_slice %218 {offsets = [0, 55], sizes = [8, 9], strides = [1, 1]} : vector<8x64xf32> to vector<8x9xf32>
    %224 = vector.extract_strided_slice %218 {offsets = [0, 0], sizes = [8, 55], strides = [1, 1]} : vector<8x64xf32> to vector<8x55xf32>
    %225 = tpu.concatenate %223, %224 in 1 : vector<8x9xf32>, vector<8x55xf32> -> vector<8x64xf32>
    %c8_i32 = arith.constant 8 : i32
    %226 = vector.broadcast %c8_i32 : i32 to vector<1x64xi32>
    %227 = arith.cmpi sge, %220, %226 : vector<1x64xi32>
    %c1_i32_61 = arith.constant 1 : i32
    %228 = vector.broadcast %c1_i32_61 : i32 to vector<1x64xi32>
    %229 = arith.cmpi sge, %222, %228 : vector<1x64xi32>
    %230 = arith.andi %227, %229 : vector<1x64xi1>
    %cst_62 = arith.constant 0.000000e+00 : f32
    %231 = vector.shape_cast %230 : vector<1x64xi1> to vector<1x64xi1>
    %232 = vector.broadcast %231 : vector<1x64xi1> to vector<8x64xi1>
    %233 = vector.broadcast %cst_62 : f32 to vector<8x64xf32>
    %234 = arith.select %232, %225, %233 : vector<8x64xi1>, vector<8x64xf32>
    %235 = vector.extract_strided_slice %218 {offsets = [0, 56], sizes = [8, 8], strides = [1, 1]} : vector<8x64xf32> to vector<8x8xf32>
    %236 = vector.extract_strided_slice %218 {offsets = [0, 0], sizes = [8, 56], strides = [1, 1]} : vector<8x64xf32> to vector<8x56xf32>
    %237 = tpu.concatenate %235, %236 in 1 : vector<8x8xf32>, vector<8x56xf32> -> vector<8x64xf32>
    %c8_i32_63 = arith.constant 8 : i32
    %238 = vector.broadcast %c8_i32_63 : i32 to vector<1x64xi32>
    %239 = arith.cmpi sge, %220, %238 : vector<1x64xi32>
    %cst_64 = arith.constant 0.000000e+00 : f32
    %240 = vector.shape_cast %239 : vector<1x64xi1> to vector<1x64xi1>
    %241 = vector.broadcast %240 : vector<1x64xi1> to vector<8x64xi1>
    %242 = vector.broadcast %cst_64 : f32 to vector<8x64xf32>
    %243 = arith.select %241, %237, %242 : vector<8x64xi1>, vector<8x64xf32>
    %244 = vector.extract_strided_slice %218 {offsets = [0, 57], sizes = [8, 7], strides = [1, 1]} : vector<8x64xf32> to vector<8x7xf32>
    %245 = vector.extract_strided_slice %218 {offsets = [0, 0], sizes = [8, 57], strides = [1, 1]} : vector<8x64xf32> to vector<8x57xf32>
    %246 = tpu.concatenate %244, %245 in 1 : vector<8x7xf32>, vector<8x57xf32> -> vector<8x64xf32>
    %c8_i32_65 = arith.constant 8 : i32
    %247 = vector.broadcast %c8_i32_65 : i32 to vector<1x64xi32>
    %248 = arith.cmpi sge, %220, %247 : vector<1x64xi32>
    %c7_i32_66 = arith.constant 7 : i32
    %249 = vector.broadcast %c7_i32_66 : i32 to vector<1x64xi32>
    %250 = arith.cmpi slt, %222, %249 : vector<1x64xi32>
    %251 = arith.andi %248, %250 : vector<1x64xi1>
    %cst_67 = arith.constant 0.000000e+00 : f32
    %252 = vector.shape_cast %251 : vector<1x64xi1> to vector<1x64xi1>
    %253 = vector.broadcast %252 : vector<1x64xi1> to vector<8x64xi1>
    %254 = vector.broadcast %cst_67 : f32 to vector<8x64xf32>
    %255 = arith.select %253, %246, %254 : vector<8x64xi1>, vector<8x64xf32>
    %256 = vector.extract_strided_slice %218 {offsets = [0, 63], sizes = [8, 1], strides = [1, 1]} : vector<8x64xf32> to vector<8x1xf32>
    %257 = vector.extract_strided_slice %218 {offsets = [0, 0], sizes = [8, 63], strides = [1, 1]} : vector<8x64xf32> to vector<8x63xf32>
    %258 = tpu.concatenate %256, %257 in 1 : vector<8x1xf32>, vector<8x63xf32> -> vector<8x64xf32>
    %c1_i32_68 = arith.constant 1 : i32
    %259 = vector.broadcast %c1_i32_68 : i32 to vector<1x64xi32>
    %260 = arith.cmpi sge, %222, %259 : vector<1x64xi32>
    %cst_69 = arith.constant 0.000000e+00 : f32
    %261 = vector.shape_cast %260 : vector<1x64xi1> to vector<1x64xi1>
    %262 = vector.broadcast %261 : vector<1x64xi1> to vector<8x64xi1>
    %263 = vector.broadcast %cst_69 : f32 to vector<8x64xf32>
    %264 = arith.select %262, %258, %263 : vector<8x64xi1>, vector<8x64xf32>
    %265 = vector.extract_strided_slice %218 {offsets = [0, 1], sizes = [8, 63], strides = [1, 1]} : vector<8x64xf32> to vector<8x63xf32>
    %266 = vector.extract_strided_slice %218 {offsets = [0, 0], sizes = [8, 1], strides = [1, 1]} : vector<8x64xf32> to vector<8x1xf32>
    %267 = tpu.concatenate %265, %266 in 1 : vector<8x63xf32>, vector<8x1xf32> -> vector<8x64xf32>
    %c7_i32_70 = arith.constant 7 : i32
    %268 = vector.broadcast %c7_i32_70 : i32 to vector<1x64xi32>
    %269 = arith.cmpi slt, %222, %268 : vector<1x64xi32>
    %cst_71 = arith.constant 0.000000e+00 : f32
    %270 = vector.shape_cast %269 : vector<1x64xi1> to vector<1x64xi1>
    %271 = vector.broadcast %270 : vector<1x64xi1> to vector<8x64xi1>
    %272 = vector.broadcast %cst_71 : f32 to vector<8x64xf32>
    %273 = arith.select %271, %267, %272 : vector<8x64xi1>, vector<8x64xf32>
    %274 = vector.extract_strided_slice %218 {offsets = [0, 7], sizes = [8, 57], strides = [1, 1]} : vector<8x64xf32> to vector<8x57xf32>
    %275 = vector.extract_strided_slice %218 {offsets = [0, 0], sizes = [8, 7], strides = [1, 1]} : vector<8x64xf32> to vector<8x7xf32>
    %276 = tpu.concatenate %274, %275 in 1 : vector<8x57xf32>, vector<8x7xf32> -> vector<8x64xf32>
    %c56_i32 = arith.constant 56 : i32
    %277 = vector.broadcast %c56_i32 : i32 to vector<1x64xi32>
    %278 = arith.cmpi slt, %220, %277 : vector<1x64xi32>
    %c1_i32_72 = arith.constant 1 : i32
    %279 = vector.broadcast %c1_i32_72 : i32 to vector<1x64xi32>
    %280 = arith.cmpi sge, %222, %279 : vector<1x64xi32>
    %281 = arith.andi %278, %280 : vector<1x64xi1>
    %cst_73 = arith.constant 0.000000e+00 : f32
    %282 = vector.shape_cast %281 : vector<1x64xi1> to vector<1x64xi1>
    %283 = vector.broadcast %282 : vector<1x64xi1> to vector<8x64xi1>
    %284 = vector.broadcast %cst_73 : f32 to vector<8x64xf32>
    %285 = arith.select %283, %276, %284 : vector<8x64xi1>, vector<8x64xf32>
    %286 = vector.extract_strided_slice %218 {offsets = [0, 8], sizes = [8, 56], strides = [1, 1]} : vector<8x64xf32> to vector<8x56xf32>
    %287 = vector.extract_strided_slice %218 {offsets = [0, 0], sizes = [8, 8], strides = [1, 1]} : vector<8x64xf32> to vector<8x8xf32>
    %288 = tpu.concatenate %286, %287 in 1 : vector<8x56xf32>, vector<8x8xf32> -> vector<8x64xf32>
    %c56_i32_74 = arith.constant 56 : i32
    %289 = vector.broadcast %c56_i32_74 : i32 to vector<1x64xi32>
    %290 = arith.cmpi slt, %220, %289 : vector<1x64xi32>
    %cst_75 = arith.constant 0.000000e+00 : f32
    %291 = vector.shape_cast %290 : vector<1x64xi1> to vector<1x64xi1>
    %292 = vector.broadcast %291 : vector<1x64xi1> to vector<8x64xi1>
    %293 = vector.broadcast %cst_75 : f32 to vector<8x64xf32>
    %294 = arith.select %292, %288, %293 : vector<8x64xi1>, vector<8x64xf32>
    %295 = vector.extract_strided_slice %218 {offsets = [0, 9], sizes = [8, 55], strides = [1, 1]} : vector<8x64xf32> to vector<8x55xf32>
    %296 = vector.extract_strided_slice %218 {offsets = [0, 0], sizes = [8, 9], strides = [1, 1]} : vector<8x64xf32> to vector<8x9xf32>
    %297 = tpu.concatenate %295, %296 in 1 : vector<8x55xf32>, vector<8x9xf32> -> vector<8x64xf32>
    %c56_i32_76 = arith.constant 56 : i32
    %298 = vector.broadcast %c56_i32_76 : i32 to vector<1x64xi32>
    %299 = arith.cmpi slt, %220, %298 : vector<1x64xi32>
    %c7_i32_77 = arith.constant 7 : i32
    %300 = vector.broadcast %c7_i32_77 : i32 to vector<1x64xi32>
    %301 = arith.cmpi slt, %222, %300 : vector<1x64xi32>
    %302 = arith.andi %299, %301 : vector<1x64xi1>
    %cst_78 = arith.constant 0.000000e+00 : f32
    %303 = vector.shape_cast %302 : vector<1x64xi1> to vector<1x64xi1>
    %304 = vector.broadcast %303 : vector<1x64xi1> to vector<8x64xi1>
    %305 = vector.broadcast %cst_78 : f32 to vector<8x64xf32>
    %306 = arith.select %304, %297, %305 : vector<8x64xi1>, vector<8x64xf32>
    %cst_79 = arith.constant 1.000000e+00 : f32
    %307 = vector.broadcast %cst_79 : f32 to vector<1x64xf32>
    %308 = tpu.concatenate %234, %243, %255, %264, %218, %273, %285, %294, %306, %307 in 0 : vector<8x64xf32>, vector<8x64xf32>, vector<8x64xf32>, vector<8x64xf32>, vector<8x64xf32>, vector<8x64xf32>, vector<8x64xf32>, vector<8x64xf32>, vector<8x64xf32>, vector<1x64xf32> -> vector<73x64xf32>
    %cst_80 = arith.constant dense<0.000000e+00> : vector<16x64xf32>
    %309 = tpu.matmul %219, %308, %cst_80 {dimension_numbers = #tpu.dot_dimension_numbers<[1], [0], [0], [1], [0, 0, 1, 1], [], []>} : vector<16x73xf32>, vector<73x64xf32>, vector<16x64xf32> -> vector<16x64xf32>
    %c0_81 = arith.constant 0 : index
    %c0_82 = arith.constant 0 : index
    %c0_83 = arith.constant 0 : index
    %310 = vector.load %arg9[%c0_81, %c0_82, %c0_83] : memref<1x16x64xf32, #tpu.memory_space<vmem>>, vector<1x16x64xf32>
    %311 = vector.shape_cast %310 : vector<1x16x64xf32> to vector<16x64xf32>
    %312 = vector.shape_cast %309 : vector<16x64xf32> to vector<1x16x64xf32>
    tpu.vector_store %arg9[%c0_81, %c0_82, %c0_83], %312 {strides = array<i32>} : memref<1x16x64xf32, #tpu.memory_space<vmem>>, vector<1x16x64xf32>,
    %cst_84 = arith.constant 0.000000e+00 : f32
    %313 = vector.broadcast %cst_84 : f32 to vector<16x64xf32>
    %314 = arith.maximumf %309, %313 : vector<16x64xf32>
    %c0_85 = arith.constant 0 : index
    %c0_86 = arith.constant 0 : index
    %315 = vector.load %arg5[%c0_85, %c0_86] : memref<16x145xf32, #tpu.memory_space<vmem>>, vector<16x145xf32>
    %316 = tpu.iota {dimensions = array<i32: 1>} : vector<1x64xi32>
    %c7_i32_87 = arith.constant 7 : i32
    %317 = vector.broadcast %c7_i32_87 : i32 to vector<1x64xi32>
    %318 = arith.andi %316, %317 : vector<1x64xi32>
    %319 = vector.extract_strided_slice %314 {offsets = [0, 55], sizes = [16, 9], strides = [1, 1]} : vector<16x64xf32> to vector<16x9xf32>
    %320 = vector.extract_strided_slice %314 {offsets = [0, 0], sizes = [16, 55], strides = [1, 1]} : vector<16x64xf32> to vector<16x55xf32>
    %321 = tpu.concatenate %319, %320 in 1 : vector<16x9xf32>, vector<16x55xf32> -> vector<16x64xf32>
    %c8_i32_88 = arith.constant 8 : i32
    %322 = vector.broadcast %c8_i32_88 : i32 to vector<1x64xi32>
    %323 = arith.cmpi sge, %316, %322 : vector<1x64xi32>
    %c1_i32_89 = arith.constant 1 : i32
    %324 = vector.broadcast %c1_i32_89 : i32 to vector<1x64xi32>
    %325 = arith.cmpi sge, %318, %324 : vector<1x64xi32>
    %326 = arith.andi %323, %325 : vector<1x64xi1>
    %cst_90 = arith.constant 0.000000e+00 : f32
    %327 = vector.shape_cast %326 : vector<1x64xi1> to vector<1x64xi1>
    %328 = vector.broadcast %327 : vector<1x64xi1> to vector<16x64xi1>
    %329 = vector.broadcast %cst_90 : f32 to vector<16x64xf32>
    %330 = arith.select %328, %321, %329 : vector<16x64xi1>, vector<16x64xf32>
    %331 = vector.extract_strided_slice %314 {offsets = [0, 56], sizes = [16, 8], strides = [1, 1]} : vector<16x64xf32> to vector<16x8xf32>
    %332 = vector.extract_strided_slice %314 {offsets = [0, 0], sizes = [16, 56], strides = [1, 1]} : vector<16x64xf32> to vector<16x56xf32>
    %333 = tpu.concatenate %331, %332 in 1 : vector<16x8xf32>, vector<16x56xf32> -> vector<16x64xf32>
    %c8_i32_91 = arith.constant 8 : i32
    %334 = vector.broadcast %c8_i32_91 : i32 to vector<1x64xi32>
    %335 = arith.cmpi sge, %316, %334 : vector<1x64xi32>
    %cst_92 = arith.constant 0.000000e+00 : f32
    %336 = vector.shape_cast %335 : vector<1x64xi1> to vector<1x64xi1>
    %337 = vector.broadcast %336 : vector<1x64xi1> to vector<16x64xi1>
    %338 = vector.broadcast %cst_92 : f32 to vector<16x64xf32>
    %339 = arith.select %337, %333, %338 : vector<16x64xi1>, vector<16x64xf32>
    %340 = vector.extract_strided_slice %314 {offsets = [0, 57], sizes = [16, 7], strides = [1, 1]} : vector<16x64xf32> to vector<16x7xf32>
    %341 = vector.extract_strided_slice %314 {offsets = [0, 0], sizes = [16, 57], strides = [1, 1]} : vector<16x64xf32> to vector<16x57xf32>
    %342 = tpu.concatenate %340, %341 in 1 : vector<16x7xf32>, vector<16x57xf32> -> vector<16x64xf32>
    %c8_i32_93 = arith.constant 8 : i32
    %343 = vector.broadcast %c8_i32_93 : i32 to vector<1x64xi32>
    %344 = arith.cmpi sge, %316, %343 : vector<1x64xi32>
    %c7_i32_94 = arith.constant 7 : i32
    %345 = vector.broadcast %c7_i32_94 : i32 to vector<1x64xi32>
    %346 = arith.cmpi slt, %318, %345 : vector<1x64xi32>
    %347 = arith.andi %344, %346 : vector<1x64xi1>
    %cst_95 = arith.constant 0.000000e+00 : f32
    %348 = vector.shape_cast %347 : vector<1x64xi1> to vector<1x64xi1>
    %349 = vector.broadcast %348 : vector<1x64xi1> to vector<16x64xi1>
    %350 = vector.broadcast %cst_95 : f32 to vector<16x64xf32>
    %351 = arith.select %349, %342, %350 : vector<16x64xi1>, vector<16x64xf32>
    %352 = vector.extract_strided_slice %314 {offsets = [0, 63], sizes = [16, 1], strides = [1, 1]} : vector<16x64xf32> to vector<16x1xf32>
    %353 = vector.extract_strided_slice %314 {offsets = [0, 0], sizes = [16, 63], strides = [1, 1]} : vector<16x64xf32> to vector<16x63xf32>
    %354 = tpu.concatenate %352, %353 in 1 : vector<16x1xf32>, vector<16x63xf32> -> vector<16x64xf32>
    %c1_i32_96 = arith.constant 1 : i32
    %355 = vector.broadcast %c1_i32_96 : i32 to vector<1x64xi32>
    %356 = arith.cmpi sge, %318, %355 : vector<1x64xi32>
    %cst_97 = arith.constant 0.000000e+00 : f32
    %357 = vector.shape_cast %356 : vector<1x64xi1> to vector<1x64xi1>
    %358 = vector.broadcast %357 : vector<1x64xi1> to vector<16x64xi1>
    %359 = vector.broadcast %cst_97 : f32 to vector<16x64xf32>
    %360 = arith.select %358, %354, %359 : vector<16x64xi1>, vector<16x64xf32>
    %361 = vector.extract_strided_slice %314 {offsets = [0, 1], sizes = [16, 63], strides = [1, 1]} : vector<16x64xf32> to vector<16x63xf32>
    %362 = vector.extract_strided_slice %314 {offsets = [0, 0], sizes = [16, 1], strides = [1, 1]} : vector<16x64xf32> to vector<16x1xf32>
    %363 = tpu.concatenate %361, %362 in 1 : vector<16x63xf32>, vector<16x1xf32> -> vector<16x64xf32>
    %c7_i32_98 = arith.constant 7 : i32
    %364 = vector.broadcast %c7_i32_98 : i32 to vector<1x64xi32>
    %365 = arith.cmpi slt, %318, %364 : vector<1x64xi32>
    %cst_99 = arith.constant 0.000000e+00 : f32
    %366 = vector.shape_cast %365 : vector<1x64xi1> to vector<1x64xi1>
    %367 = vector.broadcast %366 : vector<1x64xi1> to vector<16x64xi1>
    %368 = vector.broadcast %cst_99 : f32 to vector<16x64xf32>
    %369 = arith.select %367, %363, %368 : vector<16x64xi1>, vector<16x64xf32>
    %370 = vector.extract_strided_slice %314 {offsets = [0, 7], sizes = [16, 57], strides = [1, 1]} : vector<16x64xf32> to vector<16x57xf32>
    %371 = vector.extract_strided_slice %314 {offsets = [0, 0], sizes = [16, 7], strides = [1, 1]} : vector<16x64xf32> to vector<16x7xf32>
    %372 = tpu.concatenate %370, %371 in 1 : vector<16x57xf32>, vector<16x7xf32> -> vector<16x64xf32>
    %c56_i32_100 = arith.constant 56 : i32
    %373 = vector.broadcast %c56_i32_100 : i32 to vector<1x64xi32>
    %374 = arith.cmpi slt, %316, %373 : vector<1x64xi32>
    %c1_i32_101 = arith.constant 1 : i32
    %375 = vector.broadcast %c1_i32_101 : i32 to vector<1x64xi32>
    %376 = arith.cmpi sge, %318, %375 : vector<1x64xi32>
    %377 = arith.andi %374, %376 : vector<1x64xi1>
    %cst_102 = arith.constant 0.000000e+00 : f32
    %378 = vector.shape_cast %377 : vector<1x64xi1> to vector<1x64xi1>
    %379 = vector.broadcast %378 : vector<1x64xi1> to vector<16x64xi1>
    %380 = vector.broadcast %cst_102 : f32 to vector<16x64xf32>
    %381 = arith.select %379, %372, %380 : vector<16x64xi1>, vector<16x64xf32>
    %382 = vector.extract_strided_slice %314 {offsets = [0, 8], sizes = [16, 56], strides = [1, 1]} : vector<16x64xf32> to vector<16x56xf32>
    %383 = vector.extract_strided_slice %314 {offsets = [0, 0], sizes = [16, 8], strides = [1, 1]} : vector<16x64xf32> to vector<16x8xf32>
    %384 = tpu.concatenate %382, %383 in 1 : vector<16x56xf32>, vector<16x8xf32> -> vector<16x64xf32>
    %c56_i32_103 = arith.constant 56 : i32
    %385 = vector.broadcast %c56_i32_103 : i32 to vector<1x64xi32>
    %386 = arith.cmpi slt, %316, %385 : vector<1x64xi32>
    %cst_104 = arith.constant 0.000000e+00 : f32
    %387 = vector.shape_cast %386 : vector<1x64xi1> to vector<1x64xi1>
    %388 = vector.broadcast %387 : vector<1x64xi1> to vector<16x64xi1>
    %389 = vector.broadcast %cst_104 : f32 to vector<16x64xf32>
    %390 = arith.select %388, %384, %389 : vector<16x64xi1>, vector<16x64xf32>
    %391 = vector.extract_strided_slice %314 {offsets = [0, 9], sizes = [16, 55], strides = [1, 1]} : vector<16x64xf32> to vector<16x55xf32>
    %392 = vector.extract_strided_slice %314 {offsets = [0, 0], sizes = [16, 9], strides = [1, 1]} : vector<16x64xf32> to vector<16x9xf32>
    %393 = tpu.concatenate %391, %392 in 1 : vector<16x55xf32>, vector<16x9xf32> -> vector<16x64xf32>
    %c56_i32_105 = arith.constant 56 : i32
    %394 = vector.broadcast %c56_i32_105 : i32 to vector<1x64xi32>
    %395 = arith.cmpi slt, %316, %394 : vector<1x64xi32>
    %c7_i32_106 = arith.constant 7 : i32
    %396 = vector.broadcast %c7_i32_106 : i32 to vector<1x64xi32>
    %397 = arith.cmpi slt, %318, %396 : vector<1x64xi32>
    %398 = arith.andi %395, %397 : vector<1x64xi1>
    %cst_107 = arith.constant 0.000000e+00 : f32
    %399 = vector.shape_cast %398 : vector<1x64xi1> to vector<1x64xi1>
    %400 = vector.broadcast %399 : vector<1x64xi1> to vector<16x64xi1>
    %401 = vector.broadcast %cst_107 : f32 to vector<16x64xf32>
    %402 = arith.select %400, %393, %401 : vector<16x64xi1>, vector<16x64xf32>
    %cst_108 = arith.constant 1.000000e+00 : f32
    %403 = vector.broadcast %cst_108 : f32 to vector<1x64xf32>
    %404 = tpu.concatenate %330, %339, %351, %360, %314, %369, %381, %390, %402, %403 in 0 : vector<16x64xf32>, vector<16x64xf32>, vector<16x64xf32>, vector<16x64xf32>, vector<16x64xf32>, vector<16x64xf32>, vector<16x64xf32>, vector<16x64xf32>, vector<16x64xf32>, vector<1x64xf32> -> vector<145x64xf32>
    %cst_109 = arith.constant dense<0.000000e+00> : vector<16x64xf32>
    %405 = tpu.matmul %315, %404, %cst_109 {dimension_numbers = #tpu.dot_dimension_numbers<[1], [0], [0], [1], [0, 0, 1, 1], [], []>} : vector<16x145xf32>, vector<145x64xf32>, vector<16x64xf32> -> vector<16x64xf32>
    %c0_110 = arith.constant 0 : index
    %c0_111 = arith.constant 0 : index
    %c0_112 = arith.constant 0 : index
    %406 = vector.load %arg10[%c0_110, %c0_111, %c0_112] : memref<1x16x64xf32, #tpu.memory_space<vmem>>, vector<1x16x64xf32>
    %407 = vector.shape_cast %406 : vector<1x16x64xf32> to vector<16x64xf32>
    %408 = vector.shape_cast %405 : vector<16x64xf32> to vector<1x16x64xf32>
    tpu.vector_store %arg10[%c0_110, %c0_111, %c0_112], %408 {strides = array<i32>} : memref<1x16x64xf32, #tpu.memory_space<vmem>>, vector<1x16x64xf32>,
    %cst_113 = arith.constant 0.000000e+00 : f32
    %409 = vector.broadcast %cst_113 : f32 to vector<16x64xf32>
    %410 = arith.maximumf %405, %409 : vector<16x64xf32>
    %411 = vector.extract_strided_slice %410 {offsets = [0, 1], sizes = [16, 63], strides = [1, 1]} : vector<16x64xf32> to vector<16x63xf32>
    %412 = vector.extract_strided_slice %410 {offsets = [0, 0], sizes = [16, 1], strides = [1, 1]} : vector<16x64xf32> to vector<16x1xf32>
    %413 = tpu.concatenate %411, %412 in 1 : vector<16x63xf32>, vector<16x1xf32> -> vector<16x64xf32>
    %414 = arith.maximumf %410, %413 : vector<16x64xf32>
    %415 = vector.extract_strided_slice %414 {offsets = [0, 8], sizes = [16, 56], strides = [1, 1]} : vector<16x64xf32> to vector<16x56xf32>
    %416 = vector.extract_strided_slice %414 {offsets = [0, 0], sizes = [16, 8], strides = [1, 1]} : vector<16x64xf32> to vector<16x8xf32>
    %417 = tpu.concatenate %415, %416 in 1 : vector<16x56xf32>, vector<16x8xf32> -> vector<16x64xf32>
    %418 = arith.maximumf %414, %417 : vector<16x64xf32>
    %419 = tpu.iota {dimensions = array<i32: 0>} : vector<64x16xi32>
    %420 = tpu.iota {dimensions = array<i32: 1>} : vector<64x16xi32>
    %c2_i32_114 = arith.constant 2 : i32
    %421 = vector.broadcast %c2_i32_114 : i32 to vector<64x16xi32>
    %422 = arith.shrsi %420, %421 : vector<64x16xi32>
    %c3_i32_115 = arith.constant 3 : i32
    %423 = vector.broadcast %c3_i32_115 : i32 to vector<64x16xi32>
    %424 = arith.andi %420, %423 : vector<64x16xi32>
    %c2_i32_116 = arith.constant 2 : i32
    %425 = vector.broadcast %c2_i32_116 : i32 to vector<64x16xi32>
    %426 = arith.muli %425, %422 : vector<64x16xi32>
    %c8_i32_117 = arith.constant 8 : i32
    %427 = vector.broadcast %c8_i32_117 : i32 to vector<64x16xi32>
    %428 = arith.muli %426, %427 : vector<64x16xi32>
    %c2_i32_118 = arith.constant 2 : i32
    %429 = vector.broadcast %c2_i32_118 : i32 to vector<64x16xi32>
    %430 = arith.muli %429, %424 : vector<64x16xi32>
    %431 = arith.addi %428, %430 : vector<64x16xi32>
    %432 = arith.cmpi eq, %419, %431 : vector<64x16xi32>
    %433 = arith.extui %432 : vector<64x16xi1> to vector<64x16xi32>
    %434 = arith.sitofp %433 : vector<64x16xi32> to vector<64x16xf32>
    %cst_119 = arith.constant dense<0.000000e+00> : vector<16x16xf32>
    %435 = tpu.matmul %418, %434, %cst_119 {dimension_numbers = #tpu.dot_dimension_numbers<[1], [0], [0], [1], [0, 0, 1, 1], [], []>} : vector<16x64xf32>, vector<64x16xf32>, vector<16x16xf32> -> vector<16x16xf32>
    %c0_120 = arith.constant 0 : index
    %c0_121 = arith.constant 0 : index
    %436 = vector.load %arg6[%c0_120, %c0_121] : memref<32x145xf32, #tpu.memory_space<vmem>>, vector<32x145xf32>
    %437 = tpu.iota {dimensions = array<i32: 1>} : vector<1x16xi32>
    %c3_i32_122 = arith.constant 3 : i32
    %438 = vector.broadcast %c3_i32_122 : i32 to vector<1x16xi32>
    %439 = arith.andi %437, %438 : vector<1x16xi32>
    %440 = vector.extract_strided_slice %435 {offsets = [0, 11], sizes = [16, 5], strides = [1, 1]} : vector<16x16xf32> to vector<16x5xf32>
    %441 = vector.extract_strided_slice %435 {offsets = [0, 0], sizes = [16, 11], strides = [1, 1]} : vector<16x16xf32> to vector<16x11xf32>
    %442 = tpu.concatenate %440, %441 in 1 : vector<16x5xf32>, vector<16x11xf32> -> vector<16x16xf32>
    %c4_i32 = arith.constant 4 : i32
    %443 = vector.broadcast %c4_i32 : i32 to vector<1x16xi32>
    %444 = arith.cmpi sge, %437, %443 : vector<1x16xi32>
    %c1_i32_123 = arith.constant 1 : i32
    %445 = vector.broadcast %c1_i32_123 : i32 to vector<1x16xi32>
    %446 = arith.cmpi sge, %439, %445 : vector<1x16xi32>
    %447 = arith.andi %444, %446 : vector<1x16xi1>
    %cst_124 = arith.constant 0.000000e+00 : f32
    %448 = vector.shape_cast %447 : vector<1x16xi1> to vector<1x16xi1>
    %449 = vector.broadcast %448 : vector<1x16xi1> to vector<16x16xi1>
    %450 = vector.broadcast %cst_124 : f32 to vector<16x16xf32>
    %451 = arith.select %449, %442, %450 : vector<16x16xi1>, vector<16x16xf32>
    %452 = vector.extract_strided_slice %435 {offsets = [0, 12], sizes = [16, 4], strides = [1, 1]} : vector<16x16xf32> to vector<16x4xf32>
    %453 = vector.extract_strided_slice %435 {offsets = [0, 0], sizes = [16, 12], strides = [1, 1]} : vector<16x16xf32> to vector<16x12xf32>
    %454 = tpu.concatenate %452, %453 in 1 : vector<16x4xf32>, vector<16x12xf32> -> vector<16x16xf32>
    %c4_i32_125 = arith.constant 4 : i32
    %455 = vector.broadcast %c4_i32_125 : i32 to vector<1x16xi32>
    %456 = arith.cmpi sge, %437, %455 : vector<1x16xi32>
    %cst_126 = arith.constant 0.000000e+00 : f32
    %457 = vector.shape_cast %456 : vector<1x16xi1> to vector<1x16xi1>
    %458 = vector.broadcast %457 : vector<1x16xi1> to vector<16x16xi1>
    %459 = vector.broadcast %cst_126 : f32 to vector<16x16xf32>
    %460 = arith.select %458, %454, %459 : vector<16x16xi1>, vector<16x16xf32>
    %461 = vector.extract_strided_slice %435 {offsets = [0, 13], sizes = [16, 3], strides = [1, 1]} : vector<16x16xf32> to vector<16x3xf32>
    %462 = vector.extract_strided_slice %435 {offsets = [0, 0], sizes = [16, 13], strides = [1, 1]} : vector<16x16xf32> to vector<16x13xf32>
    %463 = tpu.concatenate %461, %462 in 1 : vector<16x3xf32>, vector<16x13xf32> -> vector<16x16xf32>
    %c4_i32_127 = arith.constant 4 : i32
    %464 = vector.broadcast %c4_i32_127 : i32 to vector<1x16xi32>
    %465 = arith.cmpi sge, %437, %464 : vector<1x16xi32>
    %c3_i32_128 = arith.constant 3 : i32
    %466 = vector.broadcast %c3_i32_128 : i32 to vector<1x16xi32>
    %467 = arith.cmpi slt, %439, %466 : vector<1x16xi32>
    %468 = arith.andi %465, %467 : vector<1x16xi1>
    %cst_129 = arith.constant 0.000000e+00 : f32
    %469 = vector.shape_cast %468 : vector<1x16xi1> to vector<1x16xi1>
    %470 = vector.broadcast %469 : vector<1x16xi1> to vector<16x16xi1>
    %471 = vector.broadcast %cst_129 : f32 to vector<16x16xf32>
    %472 = arith.select %470, %463, %471 : vector<16x16xi1>, vector<16x16xf32>
    %473 = vector.extract_strided_slice %435 {offsets = [0, 15], sizes = [16, 1], strides = [1, 1]} : vector<16x16xf32> to vector<16x1xf32>
    %474 = vector.extract_strided_slice %435 {offsets = [0, 0], sizes = [16, 15], strides = [1, 1]} : vector<16x16xf32> to vector<16x15xf32>
    %475 = tpu.concatenate %473, %474 in 1 : vector<16x1xf32>, vector<16x15xf32> -> vector<16x16xf32>
    %c1_i32_130 = arith.constant 1 : i32
    %476 = vector.broadcast %c1_i32_130 : i32 to vector<1x16xi32>
    %477 = arith.cmpi sge, %439, %476 : vector<1x16xi32>
    %cst_131 = arith.constant 0.000000e+00 : f32
    %478 = vector.shape_cast %477 : vector<1x16xi1> to vector<1x16xi1>
    %479 = vector.broadcast %478 : vector<1x16xi1> to vector<16x16xi1>
    %480 = vector.broadcast %cst_131 : f32 to vector<16x16xf32>
    %481 = arith.select %479, %475, %480 : vector<16x16xi1>, vector<16x16xf32>
    %482 = vector.extract_strided_slice %435 {offsets = [0, 1], sizes = [16, 15], strides = [1, 1]} : vector<16x16xf32> to vector<16x15xf32>
    %483 = vector.extract_strided_slice %435 {offsets = [0, 0], sizes = [16, 1], strides = [1, 1]} : vector<16x16xf32> to vector<16x1xf32>
    %484 = tpu.concatenate %482, %483 in 1 : vector<16x15xf32>, vector<16x1xf32> -> vector<16x16xf32>
    %c3_i32_132 = arith.constant 3 : i32
    %485 = vector.broadcast %c3_i32_132 : i32 to vector<1x16xi32>
    %486 = arith.cmpi slt, %439, %485 : vector<1x16xi32>
    %cst_133 = arith.constant 0.000000e+00 : f32
    %487 = vector.shape_cast %486 : vector<1x16xi1> to vector<1x16xi1>
    %488 = vector.broadcast %487 : vector<1x16xi1> to vector<16x16xi1>
    %489 = vector.broadcast %cst_133 : f32 to vector<16x16xf32>
    %490 = arith.select %488, %484, %489 : vector<16x16xi1>, vector<16x16xf32>
    %491 = vector.extract_strided_slice %435 {offsets = [0, 3], sizes = [16, 13], strides = [1, 1]} : vector<16x16xf32> to vector<16x13xf32>
    %492 = vector.extract_strided_slice %435 {offsets = [0, 0], sizes = [16, 3], strides = [1, 1]} : vector<16x16xf32> to vector<16x3xf32>
    %493 = tpu.concatenate %491, %492 in 1 : vector<16x13xf32>, vector<16x3xf32> -> vector<16x16xf32>
    %c12_i32 = arith.constant 12 : i32
    %494 = vector.broadcast %c12_i32 : i32 to vector<1x16xi32>
    %495 = arith.cmpi slt, %437, %494 : vector<1x16xi32>
    %c1_i32_134 = arith.constant 1 : i32
    %496 = vector.broadcast %c1_i32_134 : i32 to vector<1x16xi32>
    %497 = arith.cmpi sge, %439, %496 : vector<1x16xi32>
    %498 = arith.andi %495, %497 : vector<1x16xi1>
    %cst_135 = arith.constant 0.000000e+00 : f32
    %499 = vector.shape_cast %498 : vector<1x16xi1> to vector<1x16xi1>
    %500 = vector.broadcast %499 : vector<1x16xi1> to vector<16x16xi1>
    %501 = vector.broadcast %cst_135 : f32 to vector<16x16xf32>
    %502 = arith.select %500, %493, %501 : vector<16x16xi1>, vector<16x16xf32>
    %503 = vector.extract_strided_slice %435 {offsets = [0, 4], sizes = [16, 12], strides = [1, 1]} : vector<16x16xf32> to vector<16x12xf32>
    %504 = vector.extract_strided_slice %435 {offsets = [0, 0], sizes = [16, 4], strides = [1, 1]} : vector<16x16xf32> to vector<16x4xf32>
    %505 = tpu.concatenate %503, %504 in 1 : vector<16x12xf32>, vector<16x4xf32> -> vector<16x16xf32>
    %c12_i32_136 = arith.constant 12 : i32
    %506 = vector.broadcast %c12_i32_136 : i32 to vector<1x16xi32>
    %507 = arith.cmpi slt, %437, %506 : vector<1x16xi32>
    %cst_137 = arith.constant 0.000000e+00 : f32
    %508 = vector.shape_cast %507 : vector<1x16xi1> to vector<1x16xi1>
    %509 = vector.broadcast %508 : vector<1x16xi1> to vector<16x16xi1>
    %510 = vector.broadcast %cst_137 : f32 to vector<16x16xf32>
    %511 = arith.select %509, %505, %510 : vector<16x16xi1>, vector<16x16xf32>
    %512 = vector.extract_strided_slice %435 {offsets = [0, 5], sizes = [16, 11], strides = [1, 1]} : vector<16x16xf32> to vector<16x11xf32>
    %513 = vector.extract_strided_slice %435 {offsets = [0, 0], sizes = [16, 5], strides = [1, 1]} : vector<16x16xf32> to vector<16x5xf32>
    %514 = tpu.concatenate %512, %513 in 1 : vector<16x11xf32>, vector<16x5xf32> -> vector<16x16xf32>
    %c12_i32_138 = arith.constant 12 : i32
    %515 = vector.broadcast %c12_i32_138 : i32 to vector<1x16xi32>
    %516 = arith.cmpi slt, %437, %515 : vector<1x16xi32>
    %c3_i32_139 = arith.constant 3 : i32
    %517 = vector.broadcast %c3_i32_139 : i32 to vector<1x16xi32>
    %518 = arith.cmpi slt, %439, %517 : vector<1x16xi32>
    %519 = arith.andi %516, %518 : vector<1x16xi1>
    %cst_140 = arith.constant 0.000000e+00 : f32
    %520 = vector.shape_cast %519 : vector<1x16xi1> to vector<1x16xi1>
    %521 = vector.broadcast %520 : vector<1x16xi1> to vector<16x16xi1>
    %522 = vector.broadcast %cst_140 : f32 to vector<16x16xf32>
    %523 = arith.select %521, %514, %522 : vector<16x16xi1>, vector<16x16xf32>
    %cst_141 = arith.constant 1.000000e+00 : f32
    %524 = vector.broadcast %cst_141 : f32 to vector<1x16xf32>
    %525 = tpu.concatenate %451, %460, %472, %481, %435, %490, %502, %511, %523, %524 in 0 : vector<16x16xf32>, vector<16x16xf32>, vector<16x16xf32>, vector<16x16xf32>, vector<16x16xf32>, vector<16x16xf32>, vector<16x16xf32>, vector<16x16xf32>, vector<16x16xf32>, vector<1x16xf32> -> vector<145x16xf32>
    %cst_142 = arith.constant dense<0.000000e+00> : vector<32x16xf32>
    %526 = tpu.matmul %436, %525, %cst_142 {dimension_numbers = #tpu.dot_dimension_numbers<[1], [0], [0], [1], [0, 0, 1, 1], [], []>} : vector<32x145xf32>, vector<145x16xf32>, vector<32x16xf32> -> vector<32x16xf32>
    %c0_143 = arith.constant 0 : index
    %c0_144 = arith.constant 0 : index
    %c0_145 = arith.constant 0 : index
    %527 = vector.load %arg11[%c0_143, %c0_144, %c0_145] : memref<1x32x16xf32, #tpu.memory_space<vmem>>, vector<1x32x16xf32>
    %528 = vector.shape_cast %527 : vector<1x32x16xf32> to vector<32x16xf32>
    %529 = vector.shape_cast %526 : vector<32x16xf32> to vector<1x32x16xf32>
    tpu.vector_store %arg11[%c0_143, %c0_144, %c0_145], %529 {strides = array<i32>} : memref<1x32x16xf32, #tpu.memory_space<vmem>>, vector<1x32x16xf32>,
    return
  }
  func.func @transform_0(%arg0: i32) -> (i32, i32, i32) {
    %c0_i32 = arith.constant 0 : i32
    %c0_i32_0 = arith.constant 0 : i32
    %c0_i32_1 = arith.constant 0 : i32
    return %arg0, %c0_i32, %c0_i32_0 : i32, i32, i32
  }
  func.func @transform_1(%arg0: i32) -> (i32, i32) {
    %c0_i32 = arith.constant 0 : i32
    %c0_i32_0 = arith.constant 0 : i32
    %c0_i32_1 = arith.constant 0 : i32
    return %c0_i32, %c0_i32_0 : i32, i32
  }
  func.func @transform_2(%arg0: i32) -> (i32, i32) {
    %c0_i32 = arith.constant 0 : i32
    %c0_i32_0 = arith.constant 0 : i32
    %c0_i32_1 = arith.constant 0 : i32
    return %c0_i32, %c0_i32_0 : i32, i32
  }
  func.func @transform_3(%arg0: i32) -> (i32, i32) {
    %c0_i32 = arith.constant 0 : i32
    %c0_i32_0 = arith.constant 0 : i32
    %c0_i32_1 = arith.constant 0 : i32
    return %c0_i32, %c0_i32_0 : i32, i32
  }
  func.func @transform_4(%arg0: i32) -> (i32, i32) {
    %c0_i32 = arith.constant 0 : i32
    %c0_i32_0 = arith.constant 0 : i32
    %c0_i32_1 = arith.constant 0 : i32
    return %c0_i32, %c0_i32_0 : i32, i32
  }
  func.func @transform_5(%arg0: i32) -> (i32, i32) {
    %c0_i32 = arith.constant 0 : i32
    %c0_i32_0 = arith.constant 0 : i32
    %c0_i32_1 = arith.constant 0 : i32
    return %c0_i32, %c0_i32_0 : i32, i32
  }
  func.func @transform_6(%arg0: i32) -> (i32, i32, i32) {
    %c0_i32 = arith.constant 0 : i32
    %c0_i32_0 = arith.constant 0 : i32
    %c0_i32_1 = arith.constant 0 : i32
    return %arg0, %c0_i32, %c0_i32_0 : i32, i32, i32
  }
  func.func @transform_7(%arg0: i32) -> (i32, i32, i32) {
    %c0_i32 = arith.constant 0 : i32
    %c0_i32_0 = arith.constant 0 : i32
    %c0_i32_1 = arith.constant 0 : i32
    return %arg0, %c0_i32, %c0_i32_0 : i32, i32, i32
  }
  func.func @transform_8(%arg0: i32) -> (i32, i32, i32) {
    %c0_i32 = arith.constant 0 : i32
    %c0_i32_0 = arith.constant 0 : i32
    %c0_i32_1 = arith.constant 0 : i32
    return %arg0, %c0_i32, %c0_i32_0 : i32, i32, i32
  }
  func.func @transform_9(%arg0: i32) -> (i32, i32, i32) {
    %c0_i32 = arith.constant 0 : i32
    %c0_i32_0 = arith.constant 0 : i32
    %c0_i32_1 = arith.constant 0 : i32
    return %arg0, %c0_i32, %c0_i32_0 : i32, i32, i32
  }
  func.func @transform_10(%arg0: i32) -> (i32, i32, i32) {
    %c0_i32 = arith.constant 0 : i32
    %c0_i32_0 = arith.constant 0 : i32
    %c0_i32_1 = arith.constant 0 : i32
    return %arg0, %c0_i32, %c0_i32_0 : i32, i32, i32
  }
}

</mosaic_0001>

<bundles_post_ra>
// kernel: tpu_custom_call.1
= control target key start
LH: loop header
LB: loop body
LE: loop exit
PB: predicated region body
PF: predicated region fallthrough
CT: control target
= control target key end

     0   :  { %s4270_s0 = inlined_call_operand.hbm [shape: f32[2,8,256], index: 0, kind: input, shape index: {}]   ;;  %s4271_s1 = inlined_call_operand.hbm [shape: f32[8,73], index: 1, kind: input, shape index: {}]   ;;  %s4272_s2 = inlined_call_operand.hbm [shape: f32[8,73], index: 2, kind: input, shape index: {}]   ;;  %s4273_s3 = inlined_call_operand.hbm [shape: f32[16,73], index: 3, kind: input, shape index: {}]   ;;  %s4274_s4 = inlined_call_operand.hbm [shape: f32[16,145], index: 4, kind: input, shape index: {}]   ;;  %s4275_s5 = inlined_call_operand.hbm [shape: f32[32,145], index: 5, kind: input, shape index: {}]   ;;  %s4276_s6 = inlined_call_operand.hbm [shape: f32[2,8,256], index: 6, kind: output, shape index: {0}]   ;;  %s4277_s7 = inlined_call_operand.hbm [shape: f32[2,8,256], index: 7, kind: output, shape index: {1}]   ;;  %s4278_s8 = inlined_call_operand.hbm [shape: f32[2,16,64], index: 8, kind: output, shape index: {2}]   ;;  %s4279_s9 = inlined_call_operand.hbm [shape: f32[2,16,64], index: 9, kind: output, shape index: {3}]   ;;  %s4280_s10 = inlined_call_operand.vmem [shape: f32[2,32,16], index: 10, kind: output, shape index: {4}]  }
   0x1   :  { %4326 = sst [smem:[#allocation29_spill]] %s4270_s0 }
   0x2   :  { %4327 = sst [smem:[#allocation30_spill]] %s4271_s1 }
   0x3   :  { %4328 = sst [smem:[#allocation31_spill]] %s4272_s2 }
   0x4   :  { %4329 = sst [smem:[#allocation32_spill]] %s4273_s3 }
   0x5   :  { %4330 = sst [smem:[#allocation33_spill]] %s4274_s4 }
   0x6   :  { %4331 = sst [smem:[#allocation34_spill]] %s4275_s5 }
   0x7   :  { %16 = vsyncpa [#allocation3], 0 }
   0x8   :  { %18 = vsyncpa [#allocation3 + $0x1], 0 }
   0x9   :  { %19 = vsyncpa [#allocation6], 0 }
   0xa   :  { %20 = vsyncpa [#allocation9], 0 }
   0xb   :  { %21 = vsyncpa [#allocation12], 0 }
   0xc   :  { %22 = vsyncpa [#allocation4], 0 }
   0xd   :  { %24 = vsyncpa [#allocation4 + $0x1], 0 }
   0xe   :  { %25 = vsyncpa [#allocation15], 0 }
   0xf   :  { %27 = vsyncpa [#allocation15 + $0x1], 0 }
  0x10   :  { %28 = vsyncpa [#allocation18], 0 }
  0x11   :  { %30 = vsyncpa [#allocation18 + $0x1], 0  ;;  %s3162_s13 = smov 0   ;;  %s3164_s14 = smov 0  }
  0x12   :  { %s3166_s15 = smov 0   ;;  %s3168_s16 = smov 0  }
  0x13 LB: > { %4332 = sst [smem:[#allocation26_spill]] %s3046_s14  ;;  %s3056_s17 = smov [#allocation5]   ;;  %s3054_s16 = sphi %s3168_s16, %s4431_s16   ;;  %s3050_s15 = sphi %s3166_s15, %s4430_s15   ;;  %s3046_s14 = sphi %s3164_s14, %s4429_s14   ;;  %s3042_s13 = sphi %s3162_s13, %s4428_s13  }
  0x14   : > { %4333 = sst [smem:[#allocation27_spill]] %s3050_s15  ;;  %s315_s18 = sshll.u32 %s3056_s17, 4  ;;  %s316_s18 = int_to_ptr.vmem [resolvable:$true] %s315_s18 }
  0x15   : > { %s3183_s19 = sadd.s32 4294967295, %s3054_s16   ;;  %p2262_p0 = scmp.ge.s32.totalorder %s3054_s16, 1 }
  0x16   : > { %p4282_p1 = scmp.eq.s32.totalorder %s3183_s19, 0  ;;  %p302_p2 = scmp.lt.s32.totalorder %s3054_s16, 3 }
  0x17   : > { %s3057_s21 = smov [#allocation8]   ;;  %s3058_s24 = smov [#allocation7]  }
  0x18   : > { %p3188_p3 = pnand %p2262_p0, %p302_p2  ;;  %s336_s22 = sshll.u32 %s3057_s21, 4  ;;  %s3195_s22 = int_to_ptr.vmem [resolvable:$true] %s336_s22 }
  0x19   : > { %s326_s25 = sshll.u32 %s3058_s24, 4  ;;  %s2745_s27 = scalar_lea.vmem %s316_s18, 128  ;;  %s3203_s25 = int_to_ptr.vmem [resolvable:$true] %s326_s25 }
  0x1a   : > { %s4334_s20 = scalar_select %p3188_p3, 1, 0 }
  0x1b   : > { %p2601_p5 = pneg %p3188_p3  ;;  %p2746_p8 = scmp.ne.s32.totalorder %s316_s18, %s2745_s27 }
  0x1c   : > { %p2753_p11 = scmp.lt.s32.totalorder %s316_s18, %s316_s18  ;;  %p2754_p12 = scmp.lt.s32.totalorder %s2745_s27, %s2745_s27 }
  0x1d   : > { %p3199_p6 = pnand %p2601_p5, %p4282_p1 }
  0x1e   : > { %p2755_p13 = por %p2754_p12, %p2753_p11 }
  0x1f   : > { %p3207_p7 = pneg %p3199_p6 }
  0x21   : > { %p2748_p9 = pnand %p2746_p8, %p3207_p7 }
  0x23   : > { %p2749_p10 = pneg %p2748_p9 }
  0x25   : > { %p2756_p0 = pnand %p2755_p13, %p2749_p10 }
  0x27   : > { %2759 = shalt.err (!%p2756_p0)
}
  0x28   : > { %s4337_s1 = sld [smem:[#allocation30_spill]]  ;;  %s2771_s30 = scalar_lea.vmem %s3195_s22, 256 }
  0x29   : > { %p2772_p2 = scmp.ne.s32.totalorder %s3195_s22, %s2771_s30  ;;  %p2779_p9 = scmp.lt.s32.totalorder %s3195_s22, %s3195_s22 }
  0x2a   : > { %p2780_p11 = scmp.lt.s32.totalorder %s2771_s30, %s2771_s30 }
  0x2b   : > { %p2774_p5 = pnand %p2772_p2, %p3207_p7 }
  0x2c   : > { %p2781_p10 = por %p2780_p11, %p2779_p9 }
  0x2d   : > { %p2775_p8 = pneg %p2774_p5 }
  0x2e   : > { %2604 = dma.hbm_to_vmem [thread:$0]  (!%p3199_p6), %s4337_s1, 128, %s316_s18, [#allocation6]  }
  0x2f   : > { %p2782_p12 = pnand %p2781_p10, %p2775_p8 }
  0x31   : > { %2785 = shalt.err (!%p2782_p12)
}
  0x32   : > { %s3059_s11 = smov 128   ;;  %s3060_s12 = smov 8  }
  0x33   : > { %s4338_s3 = sld [smem:[#allocation32_spill]]  ;;  %s2797_s21 = scalar_lea.vmem %s3203_s25, 128 }
  0x34   : > { %p2798_p13 = scmp.ne.s32.totalorder %s3203_s25, %s2797_s21  ;;  %p2805_p5 = scmp.lt.s32.totalorder %s3203_s25, %s3203_s25 }
  0x35   : > { %p2806_p8 = scmp.lt.s32.totalorder %s2797_s21, %s2797_s21 }
  0x36   : > { %p2800_p0 = pnand %p2798_p13, %p3207_p7 }
  0x37   : > { %p2807_p9 = por %p2806_p8, %p2805_p5 }
  0x38   : > { %p2801_p2 = pneg %p2800_p0 }
  0x39   : > { %2610 = dma.hbm_to_vmem [thread:$0]  (!%p3199_p6), %s4338_s3, 256, %s3195_s22, [#allocation9], %s3059_s11, %s3059_s11, %s3060_s12  }
  0x3a   : > { %p2808_p11 = pnand %p2807_p9, %p2801_p2 }
  0x3c   : > { %2811 = shalt.err (!%p2808_p11)
}
  0x3d   : > { %s4339_s2 = sld [smem:[#allocation31_spill]]  ;;  %s3061_s22 = smov [#allocation10]  }
  0x3e   : > { %s349_s28 = sshll.u32 %s3061_s22, 4  ;;  %s350_s28 = int_to_ptr.vmem [resolvable:$true] %s349_s28 }
  0x3f   : > { %s2823_s29 = scalar_lea.vmem %s350_s28, 512  ;;  %p2831_p0 = scmp.lt.s32.totalorder %s350_s28, %s350_s28 }
  0x40   : > { %p2824_p10 = scmp.ne.s32.totalorder %s350_s28, %s2823_s29  ;;  %p2832_p5 = scmp.lt.s32.totalorder %s2823_s29, %s2823_s29 }
  0x42   : > { %p2826_p12 = pnand %p2824_p10, %p3207_p7  ;;  %p2833_p2 = por %p2832_p5, %p2831_p0 }
  0x43   : > { %2607 = dma.hbm_to_vmem [thread:$0]  (!%p3199_p6), %s4339_s2, 128, %s3203_s25, [#allocation6]  }
  0x44   : > { %p2827_p13 = pneg %p2826_p12 }
  0x46   : > { %p2834_p8 = pnand %p2833_p2, %p2827_p13 }
  0x48   : > { %2837 = shalt.err (!%p2834_p8)
}
  0x49   : > { %s3062_s30 = smov 256   ;;  %s3063_s11 = smov 16  }
  0x4a   : > { %s4340_s4 = sld [smem:[#allocation33_spill]]  ;;  %s3064_s17 = smov [#allocation11]  }
  0x4b   : > { %s362_s18 = sshll.u32 %s3064_s17, 4  ;;  %s363_s18 = int_to_ptr.vmem [resolvable:$true] %s362_s18 }
  0x4c   : > { %s2849_s21 = scalar_lea.vmem %s363_s18, 1024  ;;  %p2857_p12 = scmp.lt.s32.totalorder %s363_s18, %s363_s18 }
  0x4d   : > { %p2850_p9 = scmp.ne.s32.totalorder %s363_s18, %s2849_s21  ;;  %p2858_p13 = scmp.lt.s32.totalorder %s2849_s21, %s2849_s21 }
  0x4f   : > { %p2852_p11 = pnand %p2850_p9, %p3207_p7  ;;  %p2859_p0 = por %p2858_p13, %p2857_p12 }
  0x50   : > { %2613 = dma.hbm_to_vmem [thread:$0]  (!%p3199_p6), %s4340_s4, 512, %s350_s28, [#allocation9], %s3062_s30, %s3062_s30, %s3063_s11  }
  0x51   : > { %p2853_p10 = pneg %p2852_p11 }
  0x53   : > { %p2860_p5 = pnand %p2859_p0, %p2853_p10 }
  0x55   : > { %2863 = shalt.err (!%p2860_p5)
}
  0x56   : > { %s4341_s5 = sld [smem:[#allocation34_spill]]  ;;  %s4281_s23 = sadd.s32 4294967294, %s3054_s16  }
  0x57   : > { %s3258_s26 = sadd.s32 1, %s3054_s16   ;;  %s43_s22 = sadd.s32 1, %s3050_s15 }
  0x58   : > { %s40_s28 = ssub.s32 %s3054_s16, %s3258_s26  ;;  %p50_p7 = scmp.ne.s32.totalorder %s3050_s15, %s3046_s14 }
  0x59   : > { %p41_p2 = scmp.eq.s32.totalorder %s40_s28, 0  ;;  %p51_p8 = scmp.eq.s32.totalorder %s3054_s16, 0 }
  0x5a   : > { %p56_p9 = scmp.ne.s32.totalorder %s3046_s14, %s3042_s13  ;;  %p185_p11 = scmp.eq.s32.totalorder %s3183_s19, 1 }
  0x5b   : > { %s3270_s29 = scalar_select %p41_p2, %s3050_s15, %s43_s22  }
  0x5c   : > { %2616 = dma.hbm_to_vmem [thread:$0]  (!%p3199_p6), %s4341_s5, 1024, %s363_s18, [#allocation12], %s3062_s30, %s3062_s30, %s3063_s11  }
  0x5d   : > { %4342 = sst [smem:[#allocation28_spill]] %s3270_s29  ;;  %p52_p10 = por %p51_p8, %p50_p7 }
  0x5e   : > { %p3274_p12 = por %p4282_p1, %p56_p9  ;;  %p3278_p6 = por %p185_p11, %p50_p7 }
  0x5f   : > { %p191_p13 = scmp.eq.s32.totalorder %s4281_s23, 1  ;;  %p2639_p0 = scmp.lt.s32.totalorder %s3054_s16, 2 }
  0x60   : > { %s4343_s12 = scalar_select %p3274_p12, 1, 0 }
  0x61   : > { %s4344_s30 = scalar_select %p3278_p6, 1, 0 }
  0x62   : > { %s376_s11 = sand.u32 1, %s3050_s15   ;;  %p3286_p5 = por %p191_p13, %p56_p9 }
  0x63   : > { %s2269_s17 = sshll.u32 %s376_s11, 4  ;;  %s2466_s18 = sshll.u32 %s3054_s16, 8 }
  0x64   : > { %s4345_s25 = scalar_select %p3286_p5, 1, 0 }
  0x65   : > { %s4346_s0 = sld [smem:[#allocation29_spill]]  ;;  %s380_s22 = scalar_lea.vmem [#allocation2], %s2269_s17 }
  0x66   : > { %s388_s28 = sshll.u32 %s380_s22, 4  ;;  %p3296_p7 = pnand %p2639_p0, %p52_p10  ;;  %s389_s28 = int_to_ptr.vmem [resolvable:$true] %s388_s28 }
  0x67   : > { %s377_s1 = scalar_lea.sflag [#allocation3], %s376_s11 }
  0x68   : > { %p2866_p8 = pneg %p3296_p7 }
  0x6b   : > { %s3294_s27 = scalar_lea.hbm %s4346_s0, %s2466_s18  ;;  %s2869_s24 = scalar_lea.hbm %s4346_s0, 512 }
  0x6c   : > { %s2864_s2 = scalar_lea.hbm %s3294_s27, 256  ;;  %p2870_p10 = scmp.lt.s32.totalorder %s3294_s27, %s4346_s0 }
  0x6d   : > { %p2865_p2 = scmp.ne.s32.totalorder %s3294_s27, %s2864_s2  ;;  %p2871_p13 = scmp.lt.s32.totalorder %s2869_s24, %s2864_s2 }
  0x6f   : > { %p2867_p9 = pnand %p2866_p8, %p2865_p2  ;;  %p2872_p0 = por %p2871_p13, %p2870_p10 }
  0x71   : > { %p2868_p11 = pneg %p2867_p9 }
  0x73   : > { %p2873_p4 = pnand %p2872_p0, %p2868_p11 }
  0x75   : > { %2876 = shalt.err (!%p2873_p4)
}
  0x76   : > { %s2877_s22 = scalar_lea.vmem %s389_s28, 256  ;;  %s3065_s11 = smov [#allocation2]  }
  0x77   : > { %p2878_p1 = scmp.ne.s32.totalorder %s389_s28, %s2877_s22  ;;  %s2882_s4 = sshll.u32 %s3065_s11, 4  ;;  %s2883_s4 = int_to_ptr.vmem [resolvable:$false] %s2882_s4 }
  0x78   : > { %s2884_s5 = scalar_lea.vmem %s2883_s4, 512  ;;  %p2885_p2 = scmp.lt.s32.totalorder %s389_s28, %s2883_s4 }
  0x79   : > { %p2880_p5 = pnand %p2878_p1, %p2866_p8  ;;  %p2886_p9 = scmp.lt.s32.totalorder %s2884_s5, %s2877_s22 }
  0x7b   : > { %p2881_p6 = pneg %p2880_p5  ;;  %p2887_p12 = por %p2886_p9, %p2885_p2 }
  0x7d   : > { %p2888_p3 = pnand %p2887_p12, %p2881_p6 }
  0x7f   : > { %2891 = shalt.err (!%p2888_p3)
}
  0x80   : > { %2620 = dma.hbm_to_vmem [thread:$0]  (!%p3296_p7), %s3294_s27, 256, %s389_s28, %s377_s1  }
  0x81   : > { %p4348_p11 = scmp.ne.s32.totalorder %s4334_s20, 0 }
  0x82   : > { %s3317_s2 = sand.u32 (!%p4348_p11), 1, %s3046_s14   ;;  %p4349_p1 = scmp.ne.s32.totalorder (!%p4348_p11), %s4343_s12, 0 }
  0x83   : > { %397 = sbr.rel (%p4348_p11) target bundleno = 2804 (0xaf4), region = 44  ;;  %s3320_s3 = sshll.u32 (!%p4348_p11), %s3317_s2, 4 }
  0x84   : > { %s400_s4 = scalar_lea.sflag (!%p4348_p11), [#allocation3], %s3317_s2  ;;  %s403_s5 = scalar_lea.vmem (!%p4348_p11), [#allocation2], %s3320_s3 }
  0x88   : > { %3013 = dma.done.wait (%p4349_p1), %s400_s4, 256  }
  0x89   : > { %3015 = vsyncadd (%p4349_p1), %s400_s4, 4294967040  ;;  %p4350_p3 = scmp.eq.s32.totalorder %s3183_s19, 0 }
  0x8b   : > { %3017 = dma.done.wait (%p4350_p3), [#allocation6], 256   ;;  %p4351_p4 = pmov %p4350_p3 }
  0x8c   : > { %p4352_p12 = pmov %p4350_p3 }
  0x8d   : > { %3019 = vsyncadd (%p4351_p4), [#allocation6], 4294967040 }
  0x8e   : > { %3021 = dma.done.wait (%p4352_p12), [#allocation9], 768   ;;  %p4353_p6 = pmov %p4350_p3 }
  0x8f   : > { %p4354_p5 = pmov %p4350_p3 }
  0x90   : > { %3023 = vsyncadd (%p4353_p6), [#allocation9], 4294966528 }
  0x91   : > { %3025 = dma.done.wait (%p4354_p5), [#allocation12], 1024   ;;  %p4355_p7 = pmov %p4350_p3 }
  0x92   : > { %vm4303_vm0 = vcmask 1040384   ;;  %v3066_v0 = vmov 1.0   ;;  %v3344_v1 = vld [vmem:[%s403_s5] sm:$0xff]  ;;  %s3067_s1 = smov 112   ;;  %s3068_s20 = smov 111   ;;  %v3350_v2 = vld [vmem:[%s403_s5 + $0x8] sm:$0xff]  ;;  %v488_v4 = vlaneseq }
  0x93   : > { %3027 = vsyncadd (%p4355_p7), [#allocation12], 4294966272  ;;  %2285 = vmatprep.subr.msk.mxu1 %vm4303_vm0, %v3066_v0  ;;  %605 = vrot.lane.b32.xlu1 %v3344_v1, %s3067_s1  ;;  %s4290_s23 = smov 113   ;;  %s4312_s12 = smov 127   ;;  %v3072_v3 = vmov 0.0   ;;  %vm625_vm3 = vcmask 908288  }
  0x94   : > { %2286 = vmatpush1.msk.msra.mxu1 %vm4303_vm0, %v3066_v0  ;;  %621 = vrot.lane.b32.xlu0 %v3344_v1, %s3068_s20  ;;  %s4300_s27 = smov 1   ;;  %s4292_s28 = smov 15   ;;  %v3382_v5 = vand.u32 127, %v488_v4  ;;  %vm609_vm6 = vcmask 916480   ;;  %vm589_vm8 = vcmask 924672   ;;  %vm4287_vm11 = vcmask 1039360  }
  0x95   : > { %711 = vmatprep.mubr.f32.mxu1 %v3072_v3  ;;  %s3074_s18 = smov 16   ;;  %s3075_s21 = smov 17   ;;  %vm4286_vm12 = vcmask 7168   ;;  %vm4288_vm14 = vcmask 121856   ;;  %v487_v49 = vld [vmem:[#allocation5] sm:$0xff] }
  0x96   : > { %v3385_v6 = vadd.s32 128, %v3382_v5  ;;  %v491_v11 = vand.u32 15, %v3382_v5  ;;  %vm505_vm13 = vcmp.ge.s32.totalorder %v3382_v5, 16  ;;  %s3492_s24 = scalar_lea.vmem [#allocation13], %s3320_s3  ;;  %s3574_s17 = scalar_lea.vmem [#allocation14], %s3320_s3 }
  0x97   : > { %607 = vrot.lane.b32.xlu1 %v3350_v2, %s3067_s1  ;;  %s4296_s22 = smov 55   ;;  %s4294_s11 = smov 119  }
  0x98   : > { %623 = vrot.lane.b32.xlu0 %v3350_v2, %s3068_s20  ;;  %v492_v7 = vand.u32 15, %v3385_v6  ;;  %vm596_vm2 = vcmp.lt.s32.totalorder %v3385_v6, 240  ;;  %vm3402_vm5 = vcmp.lt.s32.totalorder %v491_v11, 15  ;;  %vm3428_vm10 = vcmp.ge.s32.totalorder %v491_v11, 1  ;;  %s4318_s4 = smov 56   ;;  %s4320_s5 = smov 120  }
  0x99   : > { %vm3457_vm15 = vmand %vm505_vm13, %vm3402_vm5  ;;  %s3096_s0 = smov 4   ;;  %s3097_s29 = smov 116  }
  0x9a   : > { %vm3388_vm1 = vcmp.lt.s32.totalorder %v492_v7, 15  ;;  %vm3406_vm7 = vcmp.ge.s32.totalorder %v492_v7, 1  ;;  %s3098_s15 = smov 5   ;;  %s3099_s14 = smov 117  }
  0x9b   : > { %587 = vrot.lane.b32.xlu1 %v3350_v2, %s4290_s23  ;;  %vm3398_vm4 = vmand %vm596_vm2, %vm3388_vm1  ;;  %p4420_p10 = scmp.ne.s32.totalorder %s4344_s30, 0 }
  0x9c   : > { %585 = vrot.lane.b32.xlu0 %v3344_v1, %s4290_s23  ;;  %vm3421_vm9 = vmand %vm596_vm2, %vm3406_vm7 }
  0x9f   : > { %571 = vrot.lane.b32.xlu1 %v3350_v2, %s4312_s12 }
  0xa0   : > { %569 = vrot.lane.b32.xlu0 %v3344_v1, %s4312_s12 }
  0xa3   : > { %556 = vrot.lane.b32.xlu1 %v3344_v1, %s4300_s27 }
  0xa4   : > { %553 = vrot.lane.b32.xlu0 %v3350_v2, %s4300_s27 }
  0xa7   : > { %536 = vrot.lane.b32.xlu1 %v3344_v1, %s4292_s28 }
  0xa8   : > { %533 = vrot.lane.b32.xlu0 %v3350_v2, %s4292_s28 }
  0xab   : > { %520 = vrot.lane.b32.xlu1 %v3344_v1, %s3074_s18 }
  0xac   : > { %517 = vrot.lane.b32.xlu0 %v3350_v2, %s3074_s18 }
  0xaf   : > { %498 = vrot.lane.b32.xlu1 %v3344_v1, %s3075_s21 }
  0xb0   : > { %494 = vrot.lane.b32.xlu0 %v3350_v2, %s3075_s21 }
 0x105   : > { %v606_v8 = vpop.permute.xlu1 %605 }
 0x106   : > { %v622_v9 = vpop.permute.xlu0 %621 }
 0x109   : > { %v608_v13 = vpop.permute.xlu1 %607 }
 0x10a   : > { %v624_v14 = vpop.permute.xlu0 %623  ;;  %v614_v19 = vsel %vm609_vm6, %v608_v13, %v606_v8  ;;  %v610_v23 = vsel %vm609_vm6, %v606_v8, %v608_v13 }
 0x10b   : > { %v630_v17 = vsel %vm625_vm3, %v624_v14, %v622_v9  ;;  %v626_v18 = vsel %vm625_vm3, %v622_v9, %v624_v14 }
 0x10c   : > { %2287 = vmatprep.subr.msk.mxu1 %vm3398_vm4, %v630_v17 }
 0x10d   : > { %2288 = vmatpush1.msk.msra.mxu1 %vm3402_vm5, %v626_v18  ;;  %v588_v21 = vpop.permute.xlu1 %587 }
 0x10e   : > { %2289 = vmatprep.subr.msk.mxu1 %vm596_vm2, %v614_v19  ;;  %v586_v22 = vpop.permute.xlu0 %585 }
 0x10f   : > { %664 = vmatpush1.msra.mxu1 %v610_v23  ;;  %v594_v25 = vsel %vm589_vm8, %v588_v21, %v586_v22  ;;  %v590_v26 = vsel %vm589_vm8, %v586_v22, %v588_v21 }
 0x110   : > { %2290 = vmatprep.subr.msk.mxu1 %vm3421_vm9, %v594_v25 }
 0x111   : > { %2291 = vmatpush1.msk.msra.mxu1 %vm3428_vm10, %v590_v26  ;;  %v572_v27 = vpop.permute.xlu1 %571 }
 0x112   : > { %v570_v28 = vpop.permute.xlu0 %569 }
 0x113   : > { %v578_v29 = vsel %vm4287_vm11, %v572_v27, %v570_v28  ;;  %v574_v30 = vsel %vm4287_vm11, %v570_v28, %v572_v27  ;;  %vm500_vm11 = vcmask 138240   ;;  %v722_v27 = vld [vmem:[#allocation7] sm:$0xff]  ;;  %v950_v28 = vshra.s32 %v3382_v5, 3 }
 0x114   : > { %2292 = vmatprep.subr.msk.mxu1 %vm3388_vm1, %v578_v29  ;;  %v3563_v29 = vand.u32 7, %v3382_v5 }
 0x115   : > { %2293 = vmatpush1.msk.msra.mxu1 %vm3402_vm5, %v574_v30  ;;  %v557_v31 = vpop.permute.xlu1 %556  ;;  %v952_v30 = vmul.u32 2, %v950_v28  ;;  %v1122_v28 = vld [vmem:[#allocation8] sm:$0xff] }
 0x116   : > { %669 = vmatprep.subr.mxu1 %v3350_v2  ;;  %v554_v32 = vpop.permute.xlu0 %553  ;;  %v954_v16 = vmul.u32 2, %v3563_v29 }
 0x117   : > { %670 = vmatpush1.msra.mxu1 %v3344_v1  ;;  %v559_v33 = vsel %vm4286_vm12, %v557_v31, %v554_v32  ;;  %v562_v34 = vsel %vm4286_vm12, %v554_v32, %v557_v31  ;;  %vm4289_vm12 = vcmask 130048   ;;  %v953_v31 = vmul.u32 16, %v952_v30 }
 0x118   : > { %2294 = vmatprep.subr.msk.mxu1 %vm3406_vm7, %v559_v33  ;;  %v3567_v32 = vshrl.u32 %v488_v4, 7 }
 0x119   : > { %2295 = vmatpush1.msk.msra.mxu1 %vm3428_vm10, %v562_v34  ;;  %v537_v35 = vpop.permute.xlu1 %536  ;;  %v3569_v33 = vadd.s32 %v954_v16, %v953_v31 }
 0x11a   : > { %v534_v36 = vpop.permute.xlu0 %533  ;;  %v933_v37 = vadd.s32 120, %v3567_v32  ;;  %v945_v46 = vadd.s32 216, %v3567_v32 }
 0x11b   : > { %v539_v38 = vsel %vm4288_vm14, %v537_v35, %v534_v36  ;;  %v542_v39 = vsel %vm4288_vm14, %v534_v36, %v537_v35  ;;  %vm3475_vm14 = vmand %vm505_vm13, %vm3428_vm10  ;;  %v949_v36 = vadd.s32 248, %v3567_v32 }
 0x11c   : > { %2296 = vmatprep.subr.msk.mxu1 %vm3388_vm1, %v539_v38  ;;  %v948_v38 = vadd.s32 240, %v3567_v32 }
 0x11d   : > { %2297 = vmatpush1.msk.msra.mxu1 %vm3457_vm15, %v542_v39  ;;  %v521_v40 = vpop.permute.xlu1 %520  ;;  %v932_v39 = vadd.s32 112, %v3567_v32 }
 0x11e   : > { %v518_v41 = vpop.permute.xlu0 %517 }
 0x11f   : > { %v523_v42 = vsel %vm4289_vm12, %v521_v40, %v518_v41  ;;  %v526_v43 = vsel %vm4289_vm12, %v518_v41, %v521_v40  ;;  %vm639_vm12 = vcmask 596992   ;;  %v947_v40 = vadd.s32 232, %v3567_v32 }
 0x120   : > { %675 = vmatprep.subr.mxu1 %v523_v42  ;;  %v931_v41 = vadd.s32 104, %v3567_v32  ;;  %v946_v42 = vadd.s32 224, %v3567_v32 }
 0x121   : > { %2298 = vmatpush1.msk.msra.mxu1 %vm505_vm13, %v526_v43  ;;  %v499_v44 = vpop.permute.xlu1 %498 }
 0x122   : > { %v495_v45 = vpop.permute.xlu0 %494 }
 0x123   : > { %v501_v47 = vsel %vm500_vm11, %v499_v44, %v495_v45  ;;  %v504_v48 = vsel %vm500_vm11, %v495_v45, %v499_v44  ;;  %v930_v45 = vadd.s32 96, %v3567_v32 }
 0x124   : > { %2299 = vmatprep.subr.msk.mxu1 %vm3406_vm7, %v501_v47  ;;  %v929_v47 = vadd.s32 88, %v3567_v32 }
 0x125   : > { %2300 = vmatpush1.msk.msra.mxu1 %vm3475_vm14, %v504_v48  ;;  %v944_v48 = vadd.s32 208, %v3567_v32 }
 0x126   : > { %2301 = vmatmul.mubr.msk.f32.vlgmr.msra.gmra.mxu1 %vm639_vm12, %v487_v49  ;;  %2302 = vmatprep.subr.msk.mxu1 %vm4303_vm0, %v3066_v0  ;;  %v928_v49 = vadd.s32 80, %v3567_v32 }
 0x127   : > { %2303 = vmatpush1.msk.msra.mxu1 %vm4303_vm0, %v3066_v0  ;;  %880 = vmatprep.mubr.f32.mxu1 %v3072_v3 }
 0x1e6   : > { %v713_v50 = vpop.f32.mrf.mxu1 }
 0x1e7   : > { %718 = vst [vmem:[%s3492_s24] sm:$0xff] %v713_v50  ;;  %v720_v51 = vmax.f32 %v713_v50, 0.0  ;;  %v943_v50 = vadd.s32 200, %v3567_v32 }
 0x1e8   : > { %v715_v52 = vpop.f32.mrf.mxu1 }
 0x1e9   : > { %719 = vst [vmem:[%s3492_s24 + $0x8] sm:$0xff] %v715_v52  ;;  %761 = vrot.lane.b32.xlu1 %v720_v51, %s4300_s27  ;;  %802 = vrot.lane.b32.xlu0 %v720_v51, %s3068_s20  ;;  %v721_v53 = vmax.f32 %v715_v52, 0.0  ;;  %v942_v52 = vadd.s32 192, %v3567_v32 }
 0x1ed   : > { %791 = vrot.lane.b32.xlu0 %v720_v51, %s3067_s1  ;;  %804 = vrot.lane.b32.xlu1 %v721_v53, %s3068_s20  ;;  %s4311_s20 = smov 121  }
 0x1f1   : > { %780 = vrot.lane.b32.xlu0 %v720_v51, %s4290_s23  ;;  %793 = vrot.lane.b32.xlu1 %v721_v53, %s3067_s1 }
 0x1f5   : > { %769 = vrot.lane.b32.xlu0 %v720_v51, %s4312_s12  ;;  %782 = vrot.lane.b32.xlu1 %v721_v53, %s4290_s23  ;;  %s4314_s23 = smov 7  }
 0x1f9   : > { %758 = vrot.lane.b32.xlu0 %v721_v53, %s4300_s27  ;;  %771 = vrot.lane.b32.xlu1 %v721_v53, %s4312_s12 }
 0x1fd   : > { %747 = vrot.lane.b32.xlu0 %v721_v53, %s4292_s28  ;;  %750 = vrot.lane.b32.xlu1 %v720_v51, %s4292_s28  ;;  %s4315_s28 = smov 71  }
 0x201   : > { %736 = vrot.lane.b32.xlu0 %v721_v53, %s3074_s18  ;;  %739 = vrot.lane.b32.xlu1 %v720_v51, %s3074_s18  ;;  %s4322_s18 = smov 63  }
 0x205   : > { %724 = vrot.lane.b32.xlu0 %v721_v53, %s3075_s21  ;;  %728 = vrot.lane.b32.xlu1 %v720_v51, %s3075_s21  ;;  %s4298_s21 = smov 65  }
 0x25b   : > { %v762_v54 = vpop.permute.xlu1 %761  ;;  %v803_v55 = vpop.permute.xlu0 %802 }
 0x25f   : > { %v792_v56 = vpop.permute.xlu0 %791  ;;  %v805_v57 = vpop.permute.xlu1 %804 }
 0x260   : > { %v806_v58 = vsel %vm625_vm3, %v803_v55, %v805_v57  ;;  %v810_v59 = vsel %vm625_vm3, %v805_v57, %v803_v55  ;;  %vm4372_vm3 = vcmask 1039360   ;;  %v3632_v55 = vadd.s32 56, %v3567_v32 }
 0x261   : > { %2304 = vmatprep.subr.msk.mxu1 %vm3398_vm4, %v810_v59  ;;  %vm4373_vm4 = vmmov %vm4372_vm3  ;;  %v3640_v57 = vadd.s32 48, %v3567_v32  ;;  %v3649_v59 = vadd.s32 40, %v3567_v32 }
 0x262   : > { %2305 = vmatpush1.msk.msra.mxu1 %vm3402_vm5, %v806_v58  ;;  %v939_v58 = vadd.s32 168, %v3567_v32 }
 0x263   : > { %v781_v60 = vpop.permute.xlu0 %780  ;;  %v794_v61 = vpop.permute.xlu1 %793 }
 0x264   : > { %v799_v62 = vsel %vm609_vm6, %v794_v61, %v792_v56  ;;  %v795_v63 = vsel %vm609_vm6, %v792_v56, %v794_v61  ;;  %v940_v56 = vadd.s32 176, %v3567_v32  ;;  %v3658_v61 = vadd.s32 32, %v3567_v32 }
 0x265   : > { %2306 = vmatprep.subr.msk.mxu1 %vm596_vm2, %v799_v62  ;;  %vm4374_vm2 = vcmask 7168   ;;  %v937_v62 = vadd.s32 152, %v3567_v32 }
 0x266   : > { %833 = vmatpush1.msra.mxu1 %v795_v63  ;;  %v3667_v63 = vadd.s32 24, %v3567_v32 }
 0x267   : > { %v770_v1 = vpop.permute.xlu0 %769  ;;  %v783_v2 = vpop.permute.xlu1 %782 }
 0x268   : > { %v784_v7 = vsel %vm589_vm8, %v781_v60, %v783_v2  ;;  %v788_v8 = vsel %vm589_vm8, %v783_v2, %v781_v60  ;;  %vm4375_vm8 = vmmov %vm4374_vm2  ;;  %v938_v60 = vadd.s32 160, %v3567_v32  ;;  %v3684_v2 = vadd.s32 16, %v3567_v32 }
 0x269   : > { %2307 = vmatprep.subr.msk.mxu1 %vm3421_vm9, %v788_v8  ;;  %vm4376_vm9 = vcmask 121856   ;;  %v3692_v8 = vadd.s32 8, %v3567_v32 }
 0x26a   : > { %2308 = vmatpush1.msk.msra.mxu1 %vm3428_vm10, %v784_v7  ;;  %v935_v7 = vadd.s32 136, %v3567_v32 }
 0x26b   : > { %v759_v9 = vpop.permute.xlu0 %758  ;;  %v772_v11 = vpop.permute.xlu1 %771 }
 0x26c   : > { %v773_v12 = vsel %vm4372_vm3, %v770_v1, %v772_v11  ;;  %v777_v6 = vsel %vm4373_vm4, %v772_v11, %v770_v1  ;;  %v763_v17 = vsel %vm4374_vm2, %v762_v54, %v759_v9  ;;  %v766_v18 = vsel %vm4375_vm8, %v759_v9, %v762_v54  ;;  %vm4377_vm3 = vmmov %vm4376_vm9 }
 0x26d   : > { %2309 = vmatprep.subr.msk.mxu1 %vm3388_vm1, %v777_v6  ;;  %vm984_vm2 = vcmp.eq.s32.totalorder %v946_v42, %v3569_v33  ;;  %vm968_vm8 = vcmp.eq.s32.totalorder %v930_v45, %v3569_v33  ;;  %v941_v54 = vadd.s32 184, %v3567_v32  ;;  %v936_v1 = vadd.s32 144, %v3567_v32 }
 0x26e   : > { %2310 = vmatpush1.msk.msra.mxu1 %vm3402_vm5, %v773_v12  ;;  %vm4378_vm5 = vcmask 130048   ;;  %v934_v9 = vadd.s32 128, %v3567_v32 }
 0x26f   : > { %v748_v13 = vpop.permute.xlu0 %747  ;;  %838 = vmatprep.subr.mxu1 %v721_v53  ;;  %v751_v14 = vpop.permute.xlu1 %750  ;;  %vm4379_vm4 = vmmov %vm4378_vm5  ;;  %v926_v53 = vadd.s32 64, %v3567_v32 }
 0x270   : > { %839 = vmatpush1.msra.mxu1 %v720_v51  ;;  %v752_v19 = vsel %vm4376_vm9, %v751_v14, %v748_v13  ;;  %v755_v20 = vsel %vm4377_vm3, %v748_v13, %v751_v14  ;;  %vm983_vm9 = vcmp.eq.s32.totalorder %v945_v46, %v3569_v33  ;;  %vm967_vm3 = vcmp.eq.s32.totalorder %v929_v47, %v3569_v33 }
 0x271   : > { %2311 = vmatprep.subr.msk.mxu1 %vm3406_vm7, %v763_v17  ;;  %v927_v51 = vadd.s32 72, %v3567_v32 }
 0x272   : > { %2312 = vmatpush1.msk.msra.mxu1 %vm3428_vm10, %v766_v18  ;;  %vm986_vm10 = vcmp.eq.s32.totalorder %v948_v38, %v3569_v33 }
 0x273   : > { %v737_v15 = vpop.permute.xlu0 %736  ;;  %2313 = vmatprep.subr.msk.mxu1 %vm3388_vm1, %v752_v19  ;;  %v740_v21 = vpop.permute.xlu1 %739  ;;  %vm987_vm1 = vcmp.eq.s32.totalorder %v949_v36, %v3569_v33 }
 0x274   : > { %v744_v22 = vsel %vm4378_vm5, %v737_v15, %v740_v21  ;;  %2314 = vmatpush1.msk.msra.mxu1 %vm3457_vm15, %v755_v20  ;;  %v741_v23 = vsel %vm4379_vm4, %v740_v21, %v737_v15  ;;  %2472 = vmatprep.subr.msk.mxu0 %vm987_vm1, %v3066_v0  ;;  %vm969_vm15 = vcmp.eq.s32.totalorder %v931_v41, %v3569_v33 }
 0x275   : > { %844 = vmatprep.subr.mxu1 %v741_v23  ;;  %vm982_vm5 = vcmp.eq.s32.totalorder %v944_v48, %v3569_v33  ;;  %vm966_vm4 = vcmp.eq.s32.totalorder %v928_v49, %v3569_v33  ;;  %vm981_vm1 = vcmp.eq.s32.totalorder %v943_v50, %v3569_v33 }
 0x276   : > { %2315 = vmatpush1.msk.msra.mxu1 %vm505_vm13, %v744_v22  ;;  %vm970_vm13 = vcmp.eq.s32.totalorder %v932_v39, %v3569_v33 }
 0x277   : > { %v725_v24 = vpop.permute.xlu0 %724  ;;  %v729_v25 = vpop.permute.xlu1 %728 }
 0x278   : > { %v730_v26 = vsel %vm500_vm11, %v729_v25, %v725_v24  ;;  %v733_v10 = vsel %vm500_vm11, %v725_v24, %v729_v25 }
 0x279   : > { %2316 = vmatprep.subr.msk.mxu1 %vm3406_vm7, %v730_v26  ;;  %vm971_vm7 = vcmp.eq.s32.totalorder %v933_v37, %v3569_v33 }
 0x27a   : > { %2317 = vmatpush1.msk.msra.mxu1 %vm3475_vm14, %v733_v10  ;;  %2473 = vmatpush3.msk.msra.mxu0 %vm971_vm7, %v3066_v0  ;;  %vm985_vm14 = vcmp.eq.s32.totalorder %v947_v40, %v3569_v33  ;;  %vm965_vm7 = vcmp.eq.s32.totalorder %v927_v51, %v3569_v33 }
 0x27b   : > { %2318 = vmatmul.mubr.msk.f32.vlgmr.msra.gmra.mxu1 %vm639_vm12, %v722_v27  ;;  %2529 = vmatprep.subr.msk.mxu1 %vm4303_vm0, %v3066_v0 }
 0x27c   : > { %2530 = vmatpush3.msk.msra.mxu1 %vm4303_vm0, %v3066_v0  ;;  %2474 = vmatprep.subr.msk.mxu0 %vm986_vm10, %v3066_v0  ;;  %vm980_vm10 = vcmp.eq.s32.totalorder %v942_v52, %v3569_v33 }
 0x27d   : > { %2475 = vmatpush3.msk.msra.mxu0 %vm970_vm13, %v3066_v0  ;;  %vm964_vm13 = vcmp.eq.s32.totalorder %v926_v53, %v3569_v33  ;;  %2549 = vmatprep.mubr.msk.f32.mxu1 %vm639_vm12, %v1122_v28 }
 0x27e   : > { %2476 = vmatprep.subr.msk.mxu0 %vm985_vm14, %v3066_v0  ;;  %vm979_vm14 = vcmp.eq.s32.totalorder %v941_v54, %v3569_v33 }
 0x27f   : > { %2477 = vmatpush3.msk.msra.mxu0 %vm969_vm15, %v3066_v0  ;;  %vm963_vm15 = vcmp.eq.s32.totalorder %v3632_v55, %v3569_v33 }
 0x280   : > { %2478 = vmatprep.subr.msk.mxu0 %vm984_vm2, %v3066_v0  ;;  %vm978_vm2 = vcmp.eq.s32.totalorder %v940_v56, %v3569_v33 }
 0x281   : > { %2479 = vmatpush3.msk.msra.mxu0 %vm968_vm8, %v3066_v0  ;;  %vm962_vm8 = vcmp.eq.s32.totalorder %v3640_v57, %v3569_v33 }
 0x282   : > { %2480 = vmatprep.subr.msk.mxu0 %vm983_vm9, %v3066_v0  ;;  %vm977_vm9 = vcmp.eq.s32.totalorder %v939_v58, %v3569_v33 }
 0x283   : > { %2481 = vmatpush3.msk.msra.mxu0 %vm967_vm3, %v3066_v0  ;;  %vm961_vm3 = vcmp.eq.s32.totalorder %v3649_v59, %v3569_v33 }
 0x284   : > { %2482 = vmatprep.subr.msk.mxu0 %vm982_vm5, %v3066_v0  ;;  %vm976_vm5 = vcmp.eq.s32.totalorder %v938_v60, %v3569_v33  ;;  %v1123_v60 = vld [vmem:[#allocation8 + $0x8] sm:$0xff] }
 0x285   : > { %2483 = vmatpush3.msk.msra.mxu0 %vm966_vm4, %v3066_v0  ;;  %vm960_vm4 = vcmp.eq.s32.totalorder %v3658_v61, %v3569_v33 }
 0x286   : > { %2484 = vmatprep.subr.msk.mxu0 %vm981_vm1, %v3066_v0  ;;  %vm975_vm1 = vcmp.eq.s32.totalorder %v937_v62, %v3569_v33 }
 0x287   : > { %2485 = vmatpush3.msk.msra.mxu0 %vm965_vm7, %v3066_v0  ;;  %vm959_vm7 = vcmp.eq.s32.totalorder %v3667_v63, %v3569_v33 }
 0x288   : > { %2486 = vmatprep.subr.msk.mxu0 %vm980_vm10, %v3066_v0  ;;  %vm974_vm10 = vcmp.eq.s32.totalorder %v936_v1, %v3569_v33 }
 0x289   : > { %2487 = vmatpush3.msk.msra.mxu0 %vm964_vm13, %v3066_v0  ;;  %vm958_vm13 = vcmp.eq.s32.totalorder %v3684_v2, %v3569_v33 }
 0x28a   : > { %2488 = vmatprep.subr.msk.mxu0 %vm979_vm14, %v3066_v0  ;;  %vm973_vm14 = vcmp.eq.s32.totalorder %v935_v7, %v3569_v33 }
 0x28b   : > { %2489 = vmatpush3.msk.msra.mxu0 %vm963_vm15, %v3066_v0  ;;  %vm957_vm15 = vcmp.eq.s32.totalorder %v3692_v8, %v3569_v33 }
 0x28c   : > { %2490 = vmatprep.subr.msk.mxu0 %vm978_vm2, %v3066_v0  ;;  %vm972_vm2 = vcmp.eq.s32.totalorder %v934_v9, %v3569_v33 }
 0x28d   : > { %2491 = vmatpush3.msk.msra.mxu0 %vm962_vm8, %v3066_v0  ;;  %vm956_vm8 = vcmp.eq.s32.totalorder %v3567_v32, %v3569_v33 }
 0x28e   : > { %2492 = vmatprep.subr.msk.mxu0 %vm977_vm9, %v3066_v0  ;;  %vm4380_vm9 = vcmask 1039360  }
 0x28f   : > { %2493 = vmatpush3.msk.msra.mxu0 %vm961_vm3, %v3066_v0  ;;  %vm4381_vm3 = vmmov %vm4380_vm9 }
 0x290   : > { %2494 = vmatprep.subr.msk.mxu0 %vm976_vm5, %v3066_v0  ;;  %vm1192_vm5 = vcmp.lt.s32.totalorder %v3382_v5, 56 }
 0x291   : > { %2495 = vmatpush3.msk.msra.mxu0 %vm960_vm4, %v3066_v0  ;;  %vm4302_vm4 = vcmask 449536  }
 0x292   : > { %2496 = vmatprep.subr.msk.mxu0 %vm975_vm1, %v3066_v0 }
 0x293   : > { %2497 = vmatpush3.msk.msra.mxu0 %vm959_vm7, %v3066_v0  ;;  %vm1203_vm7 = vcmask 457728  }
 0x294   : > { %2498 = vmatprep.subr.msk.mxu0 %vm974_vm10, %v3066_v0  ;;  %vm1134_vm10 = vcmp.ge.s32.totalorder %v3563_v29, 1 }
 0x295   : > { %2499 = vmatpush3.msk.msra.mxu0 %vm958_vm13, %v3066_v0  ;;  %vm1190_vm13 = vcmask 465920  }
 0x296   : > { %2500 = vmatprep.subr.msk.mxu0 %vm973_vm14, %v3066_v0  ;;  %vm3775_vm14 = vmand %vm1192_vm5, %vm1134_vm10 }
 0x297   : > { %2501 = vmatpush3.msk.msra.mxu0 %vm957_vm15, %v3066_v0  ;;  %vm1179_vm15 = vcmask 515072  }
 0x298   : > { %2502 = vmatprep.subr.msk.mxu0 %vm972_vm2, %v3066_v0  ;;  %vm1133_vm2 = vcmp.ge.s32.totalorder %v3382_v5, 8 }
 0x299   : > { %2503 = vmatpush3.msk.msra.mxu0 %vm956_vm8, %v3066_v0  ;;  %vm4386_vm8 = vcmask 7168   ;;  %vm3819_vm0 = vmand %vm1133_vm2, %vm1134_vm10 }
 0x33b   : > { %v3571_v34 = vpop.f32.mrf.mxu1 }
 0x33c   : > { %887 = vst [vmem:[%s3574_s17] sm:$0xff] %v3571_v34  ;;  %v889_v35 = vmax.f32 %v3571_v34, 0.0 }
 0x33d   : > { %v3582_v4 = vpop.f32.mrf.mxu1 }
 0x33e   : > { %v890_v43 = vmax.f32 %v3582_v4, 0.0  ;;  %888 = vst [vmem:[%s3574_s17 + $0x8] sm:$0xff] %v3582_v4 }
 0x340   : > { %v2724_v44 = vpack.i.bf16 %v890_v43, %v889_v35 }
 0x342   : > { %2725 = vrot.lane.b32.xlu0 %v2724_v44, %s4312_s12 }
 0x3b4   : > { %v2726_v11 = vpop.permute.xlu0 %2725 }
 0x3b5   : > { %v2728_v12 = vunpack.i.h.bf16 %v2726_v11  ;;  %v2727_v6 = vunpack.i.l.bf16 %v2726_v11  ;;  %v1307_v11 = vld [vmem:[#allocation10 + $0x8] sm:$0xff] }
 0x3b7   : > { %v897_v13 = vsel %vm4380_vm9, %v2727_v6, %v2728_v12  ;;  %v901_v14 = vsel %vm4381_vm3, %v2728_v12, %v2727_v6  ;;  %vm1156_vm9 = vcmask 56320  }
 0x3b8   : > { %v902_v17 = vmax.f32 %v889_v35, %v897_v13  ;;  %v903_v18 = vmax.f32 %v890_v43, %v901_v14 }
 0x3ba   : > { %v2729_v19 = vpack.i.bf16 %v903_v18, %v902_v17 }
 0x3bc   : > { %2730 = vrot.lane.b32.xlu1 %v2729_v19, %s3067_s1  ;;  %s3080_s1 = smov 57  }
 0x42e   : > { %v2731_v20 = vpop.permute.xlu1 %2730 }
 0x42f   : > { %v2733_v15 = vunpack.i.h.bf16 %v2731_v20  ;;  %v2732_v21 = vunpack.i.l.bf16 %v2731_v20 }
 0x431   : > { %v914_v22 = vsel %vm609_vm6, %v2733_v15, %v2732_v21  ;;  %v910_v23 = vsel %vm609_vm6, %v2732_v21, %v2733_v15  ;;  %vm1158_vm6 = vcmp.lt.s32.totalorder %v3563_v29, 7 }
 0x432   : > { %v916_v24 = vmax.f32 %v903_v18, %v914_v22  ;;  %v915_v25 = vmax.f32 %v902_v17, %v910_v23  ;;  %vm3756_vm1 = vmand %vm1192_vm5, %vm1158_vm6 }
 0x433   : > { %vm3801_vm3 = vmand %vm1133_vm2, %vm1158_vm6 }
 0x434   : > { %1116 = vmatprep.mubr.f32.mxu0 %v916_v24 }
 0x435   : > { %1117 = vmatmul.mubr.f32.vlgmr.msra.gmra.mxu0 %v915_v25 }
 0x4f5   : > { %v2504_v26 = vpop.f32.mrf.mxu0 }
 0x4f7   : > { %v2505_v10 = vpop.f32.mrf.mxu0 }
 0x4f8   : > { %v3715_v27 = vadd.f32 %v2505_v10, %v2504_v26 }
 0x4fa   : > { %1211 = vrot.lane.b32.xlu1 %v3715_v27, %s4296_s22  ;;  %1208 = vrot.lane.b32.xlu0 %v3715_v27, %s4294_s11  ;;  %s4316_s11 = smov 8   ;;  %s4309_s22 = smov 72  }
 0x4fe   : > { %1200 = vrot.lane.b32.xlu1 %v3715_v27, %s4318_s4  ;;  %1197 = vrot.lane.b32.xlu0 %v3715_v27, %s4320_s5 }
 0x502   : > { %1187 = vrot.lane.b32.xlu1 %v3715_v27, %s3080_s1  ;;  %1184 = vrot.lane.b32.xlu0 %v3715_v27, %s4311_s20 }
 0x506   : > { %1176 = vrot.lane.b32.xlu1 %v3715_v27, %s4322_s18  ;;  %1173 = vrot.lane.b32.xlu0 %v3715_v27, %s4312_s12 }
 0x50a   : > { %1166 = vrot.lane.b32.xlu1 %v3715_v27, %s4300_s27  ;;  %1163 = vrot.lane.b32.xlu0 %v3715_v27, %s4298_s21  ;;  %s4307_s21 = smov 9   ;;  %s4305_s27 = smov 73  }
 0x50e   : > { %1153 = vrot.lane.b32.xlu1 %v3715_v27, %s4314_s23  ;;  %1150 = vrot.lane.b32.xlu0 %v3715_v27, %s4315_s28 }
 0x512   : > { %1142 = vrot.lane.b32.xlu1 %v3715_v27, %s4316_s11  ;;  %1139 = vrot.lane.b32.xlu0 %v3715_v27, %s4309_s22  ;;  %s4392_s22 = smov 65  }
 0x516   : > { %1128 = vrot.lane.b32.xlu1 %v3715_v27, %s4307_s21  ;;  %1125 = vrot.lane.b32.xlu0 %v3715_v27, %s4305_s27  ;;  %s3831_s27 = scalar_lea.vmem [#allocation16], %s3320_s3  ;;  %s4391_s21 = smov 1  }
 0x56c   : > { %v1212_v31 = vpop.permute.xlu1 %1211  ;;  %v1209_v16 = vpop.permute.xlu0 %1208 }
 0x56d   : > { %v1215_v33 = vsel %vm4302_vm4, %v1209_v16, %v1212_v31  ;;  %vm1131_vm4 = vcmask 72704  }
 0x56e   : > { %2531 = vmatprep.subr.msk.mxu1 %vm3756_vm1, %v1215_v33 }
 0x56f   : > { %2532 = vmatpush3.msk.msra.mxu1 %vm3756_vm1, %v1215_v33 }
 0x570   : > { %v1201_v34 = vpop.permute.xlu1 %1200  ;;  %v1198_v35 = vpop.permute.xlu0 %1197 }
 0x571   : > { %v1204_v36 = vsel %vm1203_vm7, %v1198_v35, %v1201_v34 }
 0x572   : > { %2533 = vmatprep.subr.msk.mxu1 %vm1192_vm5, %v1204_v36 }
 0x573   : > { %2534 = vmatpush3.msk.msra.mxu1 %vm1192_vm5, %v1204_v36 }
 0x574   : > { %v1188_v38 = vpop.permute.xlu1 %1187  ;;  %v1185_v4 = vpop.permute.xlu0 %1184 }
 0x575   : > { %v1191_v39 = vsel %vm1190_vm13, %v1185_v4, %v1188_v38 }
 0x576   : > { %2535 = vmatprep.subr.msk.mxu1 %vm3775_vm14, %v1191_v39 }
 0x577   : > { %2536 = vmatpush3.msk.msra.mxu1 %vm3775_vm14, %v1191_v39 }
 0x578   : > { %v1177_v40 = vpop.permute.xlu1 %1176  ;;  %v1174_v41 = vpop.permute.xlu0 %1173 }
 0x579   : > { %v1180_v42 = vsel %vm1179_vm15, %v1174_v41, %v1177_v40 }
 0x57a   : > { %2537 = vmatprep.subr.msk.mxu1 %vm1158_vm6, %v1180_v42 }
 0x57b   : > { %2538 = vmatpush3.msk.msra.mxu1 %vm1158_vm6, %v1180_v42 }
 0x57c   : > { %v1167_v43 = vpop.permute.xlu1 %1166  ;;  %2539 = vmatprep.subr.mxu1 %v3715_v27  ;;  %v1164_v44 = vpop.permute.xlu0 %1163 }
 0x57d   : > { %v1169_v45 = vsel %vm4386_vm8, %v1164_v44, %v1167_v43  ;;  %2540 = vmatpush3.msra.mxu1 %v3715_v27  ;;  %vm4304_vm8 = vcmask 64512  }
 0x57e   : > { %2541 = vmatprep.subr.msk.mxu1 %vm1134_vm10, %v1169_v45 }
 0x57f   : > { %2542 = vmatpush3.msk.msra.mxu1 %vm1134_vm10, %v1169_v45 }
 0x580   : > { %v1154_v47 = vpop.permute.xlu1 %1153  ;;  %v1151_v48 = vpop.permute.xlu0 %1150 }
 0x581   : > { %v1157_v49 = vsel %vm1156_vm9, %v1151_v48, %v1154_v47 }
 0x582   : > { %2543 = vmatprep.subr.msk.mxu1 %vm3801_vm3, %v1157_v49 }
 0x583   : > { %2544 = vmatpush3.msk.msra.mxu1 %vm3801_vm3, %v1157_v49 }
 0x584   : > { %v1143_v50 = vpop.permute.xlu1 %1142  ;;  %v1140_v51 = vpop.permute.xlu0 %1139 }
 0x585   : > { %v1146_v52 = vsel %vm4304_vm8, %v1140_v51, %v1143_v50  ;;  %vm1301_vm8 = vcmask 523264  }
 0x586   : > { %2545 = vmatprep.subr.msk.mxu1 %vm1133_vm2, %v1146_v52 }
 0x587   : > { %2546 = vmatpush3.msk.msra.mxu1 %vm1133_vm2, %v1146_v52 }
 0x588   : > { %v1129_v54 = vpop.permute.xlu1 %1128  ;;  %v1126_v56 = vpop.permute.xlu0 %1125 }
 0x589   : > { %v1132_v58 = vsel %vm1131_vm4, %v1126_v56, %v1129_v54 }
 0x58a   : > { %2547 = vmatprep.subr.msk.mxu1 %vm3819_vm0, %v1132_v58 }
 0x58b   : > { %2548 = vmatpush3.msk.msra.mxu1 %vm3819_vm0, %v1132_v58 }
 0x58c   : > { %2550 = vmatmul.mubr.msk.f32.vlgmr.msra.gmra.mxu1 %vm639_vm12, %v1123_v60  ;;  %1446 = vmatprep.subr.mxu1 %v3072_v3  ;;  %vm4403_vm12 = vcmask 7168  }
 0x58d   : > { %2411 = vmatprep.mubr.msk.f32.mxu1 %vm500_vm11, %v1307_v11  ;;  %v1561_v11 = vshra.s32 %v3382_v5, 2 }
 0x64c   : > { %v2551_v62 = vpop.f32.mrf.mxu1 }
 0x64d   : > { %1303 = vst.msk [vmem:[%s3831_s27 + $0x8] sm:$0xff] %vm1301_vm8, %v2551_v62  ;;  %v3835_v1 = vmax.f32 %v2551_v62, 0.0  ;;  %v1306_v62 = vld [vmem:[#allocation10] sm:$0xff] }
 0x64e   : > { %v1292_v7 = vpop.f32.mrf.mxu1 }
 0x64f   : > { %1302 = vst.msk [vmem:[%s3831_s27] sm:$0xff] %vm1301_vm8, %v1292_v7  ;;  %1416 = vrot.lane.b32.xlu1 %v3835_v1, %s4318_s4  ;;  %1410 = vrot.lane.b32.xlu0 %v3835_v1, %s4320_s5  ;;  %v1304_v9 = vmax.f32 %v1292_v7, 0.0  ;;  %v1309_v7 = vld [vmem:[#allocation10 + $0x18] sm:$0xff] }
 0x653   : > { %1400 = vrot.lane.b32.xlu1 %v3835_v1, %s3080_s1  ;;  %1394 = vrot.lane.b32.xlu0 %v3835_v1, %s4311_s20  ;;  %s4393_s20 = smov 72  }
 0x657   : > { %1384 = vrot.lane.b32.xlu1 %v3835_v1, %s4322_s18  ;;  %1378 = vrot.lane.b32.xlu0 %v3835_v1, %s4312_s12  ;;  %s4394_s12 = smov 121  }
 0x65b   : > { %1368 = vrot.lane.b32.xlu1 %v3835_v1, %s4391_s21  ;;  %1362 = vrot.lane.b32.xlu0 %v3835_v1, %s4392_s22 }
 0x65f   : > { %1352 = vrot.lane.b32.xlu1 %v3835_v1, %s4314_s23  ;;  %1346 = vrot.lane.b32.xlu0 %v3835_v1, %s4315_s28  ;;  %s4395_s23 = smov 127   ;;  %s4396_s28 = smov 9  }
 0x663   : > { %1336 = vrot.lane.b32.xlu1 %v3835_v1, %s4316_s11  ;;  %1330 = vrot.lane.b32.xlu0 %v3835_v1, %s4393_s20  ;;  %s4397_s11 = smov 73  }
 0x667   : > { %1414 = vrot.lane.b32.xlu1 %v1304_v9, %s4318_s4  ;;  %1408 = vrot.lane.b32.xlu0 %v1304_v9, %s4320_s5  ;;  %s4398_s4 = smov 7   ;;  %s4399_s5 = smov 71  }
 0x66b   : > { %1398 = vrot.lane.b32.xlu1 %v1304_v9, %s3080_s1  ;;  %1392 = vrot.lane.b32.xlu0 %v1304_v9, %s4394_s12  ;;  %s4400_s12 = smov 8   ;;  %s4401_s1 = smov 55  }
 0x66f   : > { %1382 = vrot.lane.b32.xlu1 %v1304_v9, %s4322_s18  ;;  %1376 = vrot.lane.b32.xlu0 %v1304_v9, %s4395_s23  ;;  %s4402_s18 = smov 119  }
 0x673   : > { %1320 = vrot.lane.b32.xlu1 %v3835_v1, %s4396_s28  ;;  %1314 = vrot.lane.b32.xlu0 %v3835_v1, %s4397_s11 }
 0x677   : > { %1366 = vrot.lane.b32.xlu1 %v1304_v9, %s4391_s21  ;;  %1360 = vrot.lane.b32.xlu0 %v1304_v9, %s4392_s22  ;;  %s4410_s22 = smov 63  }
 0x67b   : > { %1350 = vrot.lane.b32.xlu1 %v1304_v9, %s4398_s4  ;;  %1344 = vrot.lane.b32.xlu0 %v1304_v9, %s4399_s5  ;;  %s3090_s4 = smov 12   ;;  %s3091_s5 = smov 124  }
 0x67f   : > { %1334 = vrot.lane.b32.xlu1 %v1304_v9, %s4400_s12  ;;  %1328 = vrot.lane.b32.xlu0 %v1304_v9, %s4393_s20  ;;  %s3092_s20 = smov 13  }
 0x683   : > { %1318 = vrot.lane.b32.xlu1 %v1304_v9, %s4396_s28  ;;  %1312 = vrot.lane.b32.xlu0 %v1304_v9, %s4397_s11  ;;  %s3964_s28 = scalar_lea.vmem [#allocation17], %s3320_s3  ;;  %s4411_s3 = smov 56  }
 0x684   : > { %s4412_s11 = smov 120  }
 0x687   : > { %1432 = vrot.lane.b32.xlu1 %v3835_v1, %s4401_s1  ;;  %1426 = vrot.lane.b32.xlu0 %v3835_v1, %s4402_s18 }
 0x68b   : > { %1430 = vrot.lane.b32.xlu1 %v1304_v9, %s4401_s1  ;;  %1424 = vrot.lane.b32.xlu0 %v1304_v9, %s4402_s18  ;;  %s3093_s18 = smov 125   ;;  %s4413_s1 = smov 15  }
 0x6c1   : > { %v1417_v12 = vpop.permute.xlu1 %1416  ;;  %v1411_v6 = vpop.permute.xlu0 %1410 }
 0x6c2   : > { %v1421_v13 = vsel %vm1203_vm7, %v1411_v6, %v1417_v12  ;;  %v3960_v12 = vand.u32 3, %v3382_v5  ;;  %v1563_v6 = vmul.u32 2, %v1561_v11 }
 0x6c3   : > { %2394 = vmatpush1.msk.msra.mxu1 %vm1192_vm5, %v1421_v13 }
 0x6c4   : > { %1448 = vmatprep.subr.mxu1 %v3072_v3  ;;  %v1565_v13 = vmul.u32 2, %v3960_v12 }
 0x6c5   : > { %v1401_v14 = vpop.permute.xlu1 %1400  ;;  %v1395_v17 = vpop.permute.xlu0 %1394 }
 0x6c6   : > { %v1405_v27 = vsel %vm1190_vm13, %v1395_v17, %v1401_v14  ;;  %v1564_v17 = vmul.u32 8, %v1563_v6 }
 0x6c9   : > { %v1385_v18 = vpop.permute.xlu1 %1384  ;;  %v1379_v19 = vpop.permute.xlu0 %1378 }
 0x6ca   : > { %v1389_v33 = vsel %vm1179_vm15, %v1379_v19, %v1385_v18  ;;  %v1566_v19 = vadd.s32 %v1565_v13, %v1564_v17 }
 0x6cd   : > { %v1369_v20 = vpop.permute.xlu1 %1368  ;;  %v1363_v15 = vpop.permute.xlu0 %1362 }
 0x6ce   : > { %v1373_v4 = vsel %vm4403_vm12, %v1363_v15, %v1369_v20 }
 0x6d1   : > { %v1353_v21 = vpop.permute.xlu1 %1352  ;;  %v1347_v22 = vpop.permute.xlu0 %1346 }
 0x6d2   : > { %v1357_v42 = vsel %vm1156_vm9, %v1347_v22, %v1353_v21 }
 0x6d5   : > { %v1337_v23 = vpop.permute.xlu1 %1336  ;;  %v1331_v24 = vpop.permute.xlu0 %1330 }
 0x6d9   : > { %v1415_v25 = vpop.permute.xlu1 %1414  ;;  %v1409_v26 = vpop.permute.xlu0 %1408 }
 0x6da   : > { %v1420_v10 = vsel %vm1203_vm7, %v1409_v26, %v1415_v25 }
 0x6db   : > { %2395 = vmatpush1.msk.msra.mxu1 %vm1192_vm5, %v1420_v10  ;;  %vm4404_vm5 = vmmov %vm4403_vm12  ;;  %vm1569_vm12 = vcmp.eq.s32.totalorder %v3684_v2, %v1566_v19 }
 0x6dc   : > { %1450 = vmatprep.subr.mxu1 %v3072_v3 }
 0x6dd   : > { %v1399_v28 = vpop.permute.xlu1 %1398  ;;  %2396 = vmatpush1.msk.msra.mxu1 %vm3775_vm14, %v1405_v27  ;;  %v1393_v31 = vpop.permute.xlu0 %1392 }
 0x6de   : > { %v1404_v16 = vsel %vm1190_vm13, %v1393_v31, %v1399_v28  ;;  %1452 = vmatprep.subr.mxu1 %v3072_v3  ;;  %vm4407_vm13 = vcmask 1040384  }
 0x6df   : > { %2397 = vmatpush1.msk.msra.mxu1 %vm3775_vm14, %v1404_v16  ;;  %vm4408_vm14 = vcmask 449536  }
 0x6e0   : > { %1454 = vmatprep.subr.mxu1 %v3072_v3 }
 0x6e1   : > { %v1383_v34 = vpop.permute.xlu1 %1382  ;;  %2398 = vmatpush1.msk.msra.mxu1 %vm1158_vm6, %v1389_v33  ;;  %v1377_v35 = vpop.permute.xlu0 %1376  ;;  %v1673_v33 = vld [vmem:[#allocation11 + $0x8] sm:$0xff] }
 0x6e2   : > { %v1388_v36 = vsel %vm1179_vm15, %v1377_v35, %v1383_v34  ;;  %1456 = vmatprep.subr.mxu1 %v3072_v3 }
 0x6e3   : > { %2399 = vmatpush1.msk.msra.mxu1 %vm1158_vm6, %v1388_v36  ;;  %vm4405_vm6 = vcmask 64512  }
 0x6e4   : > { %1458 = vmatprep.subr.mxu1 %v3072_v3  ;;  %v1341_v47 = vsel %vm4405_vm6, %v1331_v24, %v1337_v23 }
 0x6e5   : > { %v1321_v37 = vpop.permute.xlu1 %1320  ;;  %1459 = vmatpush1.msra.mxu1 %v3835_v1  ;;  %v1315_v38 = vpop.permute.xlu0 %1314 }
 0x6e6   : > { %1460 = vmatprep.subr.mxu1 %v3072_v3  ;;  %v1325_v50 = vsel %vm1131_vm4, %v1315_v38, %v1321_v37 }
 0x6e7   : > { %1461 = vmatpush1.msra.mxu1 %v1304_v9  ;;  %v1308_v9 = vld [vmem:[#allocation10 + $0x10] sm:$0xff] }
 0x6e8   : > { %1462 = vmatprep.subr.mxu1 %v3072_v3 }
 0x6e9   : > { %v1367_v39 = vpop.permute.xlu1 %1366  ;;  %2400 = vmatpush1.msk.msra.mxu1 %vm1134_vm10, %v1373_v4  ;;  %v1361_v40 = vpop.permute.xlu0 %1360 }
 0x6ea   : > { %v1372_v41 = vsel %vm4404_vm5, %v1361_v40, %v1367_v39  ;;  %1464 = vmatprep.subr.mxu1 %v3072_v3  ;;  %vm1568_vm5 = vcmp.eq.s32.totalorder %v3692_v8, %v1566_v19 }
 0x6eb   : > { %2401 = vmatpush1.msk.msra.mxu1 %vm1134_vm10, %v1372_v41  ;;  %vm4406_vm10 = vmmov %vm4405_vm6  ;;  %vm1567_vm6 = vcmp.eq.s32.totalorder %v3567_v32, %v1566_v19 }
 0x6ec   : > { %1466 = vmatprep.subr.mxu1 %v3072_v3 }
 0x6ed   : > { %v1351_v43 = vpop.permute.xlu1 %1350  ;;  %2402 = vmatpush1.msk.msra.mxu1 %vm3801_vm3, %v1357_v42  ;;  %v1345_v44 = vpop.permute.xlu0 %1344 }
 0x6ee   : > { %v1356_v45 = vsel %vm1156_vm9, %v1345_v44, %v1351_v43  ;;  %1468 = vmatprep.subr.mxu1 %v3072_v3  ;;  %vm1571_vm9 = vcmp.eq.s32.totalorder %v3658_v61, %v1566_v19 }
 0x6ef   : > { %2403 = vmatpush1.msk.msra.mxu1 %vm3801_vm3, %v1356_v45  ;;  %vm1570_vm3 = vcmp.eq.s32.totalorder %v3667_v63, %v1566_v19 }
 0x6f0   : > { %1470 = vmatprep.subr.mxu1 %v3072_v3 }
 0x6f1   : > { %v1335_v29 = vpop.permute.xlu1 %1334  ;;  %2404 = vmatpush1.msk.msra.mxu1 %vm1133_vm2, %v1341_v47  ;;  %v1329_v48 = vpop.permute.xlu0 %1328 }
 0x6f2   : > { %v1340_v49 = vsel %vm4406_vm10, %v1329_v48, %v1335_v29  ;;  %1472 = vmatprep.subr.mxu1 %v3072_v3  ;;  %vm1792_vm10 = vcmask 105472  }
 0x6f3   : > { %2405 = vmatpush1.msk.msra.mxu1 %vm1133_vm2, %v1340_v49  ;;  %vm1572_vm2 = vcmp.eq.s32.totalorder %v3649_v59, %v1566_v19 }
 0x6f4   : > { %1474 = vmatprep.subr.mxu1 %v3072_v3 }
 0x6f5   : > { %v1319_v46 = vpop.permute.xlu1 %1318  ;;  %2406 = vmatpush1.msk.msra.mxu1 %vm3819_vm0, %v1325_v50  ;;  %v1313_v51 = vpop.permute.xlu0 %1312 }
 0x6f6   : > { %v1324_v52 = vsel %vm1131_vm4, %v1313_v51, %v1319_v46  ;;  %1476 = vmatprep.subr.mxu1 %v3072_v3  ;;  %vm1574_vm4 = vcmp.eq.s32.totalorder %v3632_v55, %v1566_v19 }
 0x6f7   : > { %2407 = vmatpush1.msk.msra.mxu1 %vm3819_vm0, %v1324_v52  ;;  %vm4409_vm0 = vmmov %vm4408_vm14  ;;  %2552 = vmatprep.subr.msk.mxu0 %vm1574_vm4, %v3066_v0 }
 0x6f8   : > { %1504 = vmatprep.subr.mxu1 %v3072_v3  ;;  %2553 = vmatpush3.msk.msra.mxu0 %vm1574_vm4, %v3066_v0 }
 0x6f9   : > { %v1433_v54 = vpop.permute.xlu1 %1432  ;;  %2408 = vmatpush2.msk.msra.mxu1 %vm4407_vm13, %v3066_v0  ;;  %v1427_v56 = vpop.permute.xlu0 %1426 }
 0x6fa   : > { %v1437_v58 = vsel %vm4408_vm14, %v1427_v56, %v1433_v54  ;;  %1506 = vmatprep.subr.mxu1 %v3072_v3  ;;  %vm1738_vm14 = vcmp.lt.s32.totalorder %v3960_v12, 3 }
 0x6fb   : > { %2409 = vmatpush2.msk.msra.mxu1 %vm3756_vm1, %v1437_v58 }
 0x6fc   : > { %1508 = vmatprep.subr.mxu1 %v3072_v3 }
 0x6fd   : > { %v1431_v60 = vpop.permute.xlu1 %1430  ;;  %v1425_v53 = vpop.permute.xlu0 %1424 }
 0x6fe   : > { %v1436_v1 = vsel %vm4409_vm0, %v1425_v53, %v1431_v60  ;;  %vm4415_vm0 = vcmask 121856  }
 0x6ff   : > { %2410 = vmatpush2.msk.msra.mxu1 %vm3756_vm1, %v1436_v1  ;;  %vm1573_vm1 = vcmp.eq.s32.totalorder %v3640_v57, %v1566_v19  ;;  %vm4416_vm4 = vmmov %vm4415_vm0 }
 0x700   : > { %1511 = vmatmul.mubr.f32.vlgmr.msra.gmra.mxu1 %v1306_v62  ;;  %2554 = vmatprep.subr.msk.mxu0 %vm1573_vm1, %v3066_v0 }
 0x701   : > { %2412 = vmatprep.mubr.msk.f32.mxu1 %vm500_vm11, %v1309_v7  ;;  %2555 = vmatpush3.msk.msra.mxu0 %vm1573_vm1, %v3066_v0  ;;  %vm1697_vm1 = vcmp.ge.s32.totalorder %v3382_v5, 4 }
 0x702   : > { %2556 = vmatprep.subr.msk.mxu0 %vm1572_vm2, %v3066_v0 }
 0x703   : > { %2557 = vmatpush3.msk.msra.mxu0 %vm1572_vm2, %v3066_v0  ;;  %vm4417_vm2 = vcmask 7168  }
 0x704   : > { %1516 = vmatmul.mubr.f32.gmra.mxu1 %v1308_v9  ;;  %2558 = vmatprep.subr.msk.mxu0 %vm1571_vm9, %v3066_v0 }
 0x705   : > { %2559 = vmatpush3.msk.msra.mxu0 %vm1571_vm9, %v3066_v0  ;;  %vm1735_vm9 = vcmask 23552  }
 0x706   : > { %2560 = vmatprep.subr.msk.mxu0 %vm1570_vm3, %v3066_v0 }
 0x707   : > { %2561 = vmatpush3.msk.msra.mxu0 %vm1570_vm3, %v3066_v0  ;;  %vm4418_vm3 = vmmov %vm4417_vm2 }
 0x708   : > { %2562 = vmatprep.subr.msk.mxu0 %vm1569_vm12, %v3066_v0 }
 0x709   : > { %2563 = vmatpush3.msk.msra.mxu0 %vm1569_vm12, %v3066_v0  ;;  %vm1739_vm12 = vmand %vm1697_vm1, %vm1738_vm14 }
 0x70a   : > { %2564 = vmatprep.subr.msk.mxu0 %vm1568_vm5, %v3066_v0 }
 0x70b   : > { %2565 = vmatpush3.msk.msra.mxu0 %vm1568_vm5, %v3066_v0  ;;  %vm1716_vm5 = vcmask 31744  }
 0x70c   : > { %2566 = vmatprep.subr.msk.mxu0 %vm1567_vm6, %v3066_v0 }
 0x70d   : > { %2567 = vmatpush3.msk.msra.mxu0 %vm1567_vm6, %v3066_v0  ;;  %vm1694_vm6 = vcmask 39936  }
 0x70e   : > { %1852 = vmatprep.subr.mxu0 %v3072_v3 }
 0x7c0   : > { %v1512_v14 = vpop.f32.mrf.mxu1 }
 0x7c1   : > { %1521 = vst.msk [vmem:[%s3964_s28] sm:$0xff] %vm1301_vm8, %v1512_v14  ;;  %v1523_v30 = vmax.f32 %v1512_v14, 0.0 }
 0x7c2   : > { %v1514_v18 = vpop.f32.mrf.mxu1 }
 0x7c3   : > { %1533 = vrot.lane.b32.xlu1 %v1523_v30, %s4410_s22  ;;  %1527 = vrot.lane.b32.xlu0 %v1523_v30, %s4395_s23 }
 0x7c4   : > { %v1517_v20 = vpop.f32.mrf.mxu1 }
 0x7c5   : > { %1522 = vst.msk [vmem:[%s3964_s28 + $0x8] sm:$0xff] %vm1301_vm8, %v1517_v20  ;;  %v1524_v15 = vmax.f32 %v1517_v20, 0.0 }
 0x7c6   : > { %v1519_v21 = vpop.f32.mrf.mxu1 }
 0x7c7   : > { %1535 = vrot.lane.b32.xlu1 %v1524_v15, %s4410_s22  ;;  %1529 = vrot.lane.b32.xlu0 %v1524_v15, %s4395_s23  ;;  %s4414_s22 = smov 113  }
 0x835   : > { %v1534_v55 = vpop.permute.xlu1 %1533  ;;  %v1528_v57 = vpop.permute.xlu0 %1527 }
 0x836   : > { %v1539_v59 = vsel %vm1179_vm15, %v1528_v57, %v1534_v55 }
 0x837   : > { %v1541_v61 = vmax.f32 %v1523_v30, %v1539_v59 }
 0x839   : > { %1551 = vrot.lane.b32.xlu1 %v1541_v61, %s4411_s3  ;;  %v1536_v63 = vpop.permute.xlu1 %1535  ;;  %1545 = vrot.lane.b32.xlu0 %v1541_v61, %s4412_s11  ;;  %v1530_v2 = vpop.permute.xlu0 %1529 }
 0x83a   : > { %v1540_v8 = vsel %vm1179_vm15, %v1530_v2, %v1536_v63  ;;  %vm1795_vm15 = vcmp.lt.s32.totalorder %v3382_v5, 12  ;;  %v1677_v5 = vld [vmem:[#allocation11 + $0x28] sm:$0xff] }
 0x83b   : > { %v1542_v32 = vmax.f32 %v1524_v15, %v1540_v8  ;;  %v1672_v8 = vld [vmem:[#allocation11] sm:$0xff] }
 0x83d   : > { %1553 = vrot.lane.b32.xlu1 %v1542_v32, %s4411_s3  ;;  %1547 = vrot.lane.b32.xlu0 %v1542_v32, %s4412_s11  ;;  %s3094_s3 = smov 3   ;;  %s3095_s11 = smov 115  }
 0x8ab   : > { %v1552_v22 = vpop.permute.xlu1 %1551  ;;  %v1546_v23 = vpop.permute.xlu0 %1545 }
 0x8ac   : > { %v1557_v24 = vsel %vm1203_vm7, %v1546_v23, %v1552_v22  ;;  %v1679_v22 = vld [vmem:[#allocation11 + $0x38] sm:$0xff]  ;;  %v1678_v23 = vld [vmem:[#allocation11 + $0x30] sm:$0xff] }
 0x8ad   : > { %v1559_v25 = vmax.f32 %v1541_v61, %v1557_v24 }
 0x8af   : > { %v1554_v26 = vpop.permute.xlu1 %1553  ;;  %2568 = vmatprep.mubr.msk.f32.mxu0 %vm1301_vm8, %v1559_v25  ;;  %v1548_v10 = vpop.permute.xlu0 %1547 }
 0x8b0   : > { %v1558_v27 = vsel %vm1203_vm7, %v1548_v10, %v1554_v26  ;;  %vm1813_vm7 = vcmask 97280  }
 0x8b1   : > { %v1560_v28 = vmax.f32 %v1542_v32, %v1558_v27 }
 0x8b3   : > { %2569 = vmatmul.mubr.msk.f32.vlgmr.msra.gmra.mxu0 %vm1301_vm8, %v1560_v28  ;;  %vm1698_vm8 = vcmp.ge.s32.totalorder %v3960_v12, 1  ;;  %v1675_v12 = vld [vmem:[#allocation11 + $0x18] sm:$0xff] }
 0x8b4   : > { %2448 = vmatprep.mubr.msk.f32.mxu0 %vm500_vm11, %v1673_v33  ;;  %vm1796_vm13 = vmand %vm1795_vm15, %vm1698_vm8 }
 0x973   : > { %v4009_v31 = vpop.f32.mrf.mxu0 }
 0x974   : > { %1809 = vrot.lane.b32.xlu1 %v4009_v31, %s3090_s4  ;;  %1803 = vrot.lane.b32.xlu0 %v4009_v31, %s3091_s5 }
 0x975   : > { %v4027_v16 = vpop.f32.mrf.mxu0 }
 0x978   : > { %1788 = vrot.lane.b32.xlu1 %v4009_v31, %s3092_s20  ;;  %1782 = vrot.lane.b32.xlu0 %v4009_v31, %s3093_s18 }
 0x97c   : > { %1770 = vrot.lane.b32.xlu1 %v4009_v31, %s4413_s1  ;;  %1764 = vrot.lane.b32.xlu0 %v4009_v31, %s4395_s23 }
 0x980   : > { %1752 = vrot.lane.b32.xlu1 %v4009_v31, %s4391_s21  ;;  %1746 = vrot.lane.b32.xlu0 %v4009_v31, %s4414_s22 }
 0x984   : > { %1731 = vrot.lane.b32.xlu1 %v4009_v31, %s3094_s3  ;;  %1725 = vrot.lane.b32.xlu0 %v4009_v31, %s3095_s11 }
 0x988   : > { %1712 = vrot.lane.b32.xlu1 %v4009_v31, %s3096_s0  ;;  %1706 = vrot.lane.b32.xlu0 %v4009_v31, %s3097_s29 }
 0x98c   : > { %1807 = vrot.lane.b32.xlu1 %v4027_v16, %s3090_s4  ;;  %1801 = vrot.lane.b32.xlu0 %v4027_v16, %s3091_s5  ;;  %s1946_s4 = sand.u32 1, %s3183_s19   ;;  %s4135_s5 = sshll.u32 %s3183_s19, 8 }
 0x990   : > { %1786 = vrot.lane.b32.xlu1 %v4027_v16, %s3092_s20  ;;  %1780 = vrot.lane.b32.xlu0 %v4027_v16, %s3093_s18  ;;  %s3102_s18 = smov [#allocation14]  }
 0x994   : > { %1768 = vrot.lane.b32.xlu1 %v4027_v16, %s4413_s1  ;;  %1762 = vrot.lane.b32.xlu0 %v4027_v16, %s4395_s23  ;;  %s3100_s23 = smov 11   ;;  %s2896_s1 = sshll.u32 %s3102_s18, 4  ;;  %s2897_s1 = int_to_ptr.vmem [resolvable:$false] %s2896_s1 }
 0x998   : > { %1690 = vrot.lane.b32.xlu1 %v4009_v31, %s3098_s15  ;;  %1684 = vrot.lane.b32.xlu0 %v4009_v31, %s3099_s14 }
 0x99c   : > { %1750 = vrot.lane.b32.xlu1 %v4027_v16, %s4391_s21  ;;  %1744 = vrot.lane.b32.xlu0 %v4027_v16, %s4414_s22  ;;  %s3101_s21 = smov 123   ;;  %s2898_s22 = scalar_lea.vmem %s2897_s1, 512 }
 0x9a0   : > { %1729 = vrot.lane.b32.xlu1 %v4027_v16, %s3094_s3  ;;  %1723 = vrot.lane.b32.xlu0 %v4027_v16, %s3095_s11 }
 0x9a4   : > { %1710 = vrot.lane.b32.xlu1 %v4027_v16, %s3096_s0  ;;  %1704 = vrot.lane.b32.xlu0 %v4027_v16, %s3097_s29  ;;  %s1976_s0 = sshll.u32 %s3492_s24, 4  ;;  %s2019_s29 = sshll.u32 %s3964_s28, 4  ;;  %s4125_s0 = int_to_ptr.vmem [resolvable:$true] %s1976_s0  ;;  %s4131_s29 = int_to_ptr.vmem [resolvable:$true] %s2019_s29 }
 0x9a8   : > { %1688 = vrot.lane.b32.xlu1 %v4027_v16, %s3098_s15  ;;  %1682 = vrot.lane.b32.xlu0 %v4027_v16, %s3099_s14  ;;  %s1990_s14 = sshll.u32 %s3574_s17, 4  ;;  %s2003_s15 = sshll.u32 %s3831_s27, 4  ;;  %s4127_s14 = int_to_ptr.vmem [resolvable:$true] %s1990_s14  ;;  %s4129_s15 = int_to_ptr.vmem [resolvable:$true] %s2003_s15 }
 0x9a9   : > { %s1988_s27 = scalar_lea.hbm %s4277_s7, %s4135_s5  ;;  %s4141_s17 = scalar_lea.sflag [#allocation15], %s1946_s4 }
 0x9aa   : > { %s2892_s28 = scalar_lea.vmem %s4127_s14, 256  ;;  %p2899_p2 = scmp.lt.s32.totalorder %s4127_s14, %s2897_s1 }
 0x9ab   : > { %p2893_p8 = scmp.ne.s32.totalorder %s4127_s14, %s2892_s28  ;;  %p2900_p9 = scmp.lt.s32.totalorder %s2898_s22, %s2892_s28 }
 0x9ac   : > { %1828 = vrot.lane.b32.xlu1 %v4009_v31, %s3100_s23  ;;  %1822 = vrot.lane.b32.xlu0 %v4009_v31, %s3101_s21 }
 0x9ad   : > { %p2894_p13 = pnand %p2893_p8, %p4420_p10  ;;  %p2901_p11 = por %p2900_p9, %p2899_p2 }
 0x9af   : > { %p2895_p0 = pneg %p2894_p13 }
 0x9b0   : > { %1826 = vrot.lane.b32.xlu1 %v4027_v16, %s3100_s23  ;;  %1820 = vrot.lane.b32.xlu0 %v4027_v16, %s3101_s21 }
 0x9b1   : > { %p2902_p1 = pnand %p2901_p11, %p2895_p0 }
 0x9e6   : > { %v1810_v34 = vpop.permute.xlu1 %1809  ;;  %v1804_v35 = vpop.permute.xlu0 %1803 }
 0x9e7   : > { %v1815_v36 = vsel %vm1813_vm7, %v1804_v35, %v1810_v34 }
 0x9e8   : > { %2431 = vmatpush1.msk.msra.mxu0 %vm1795_vm15, %v1815_v36 }
 0x9e9   : > { %1854 = vmatprep.subr.mxu0 %v3072_v3 }
 0x9ea   : > { %v1789_v37 = vpop.permute.xlu1 %1788  ;;  %v1783_v38 = vpop.permute.xlu0 %1782 }
 0x9eb   : > { %v1794_v49 = vsel %vm1792_vm10, %v1783_v38, %v1789_v37 }
 0x9ee   : > { %v1771_v4 = vpop.permute.xlu1 %1770  ;;  %v1765_v39 = vpop.permute.xlu0 %1764 }
 0x9ef   : > { %v1775_v52 = vsel %vm4415_vm0, %v1765_v39, %v1771_v4 }
 0x9f2   : > { %v1753_v40 = vpop.permute.xlu1 %1752  ;;  %v1747_v41 = vpop.permute.xlu0 %1746 }
 0x9f3   : > { %v1757_v62 = vsel %vm4417_vm2, %v1747_v41, %v1753_v40 }
 0x9f6   : > { %v1732_v42 = vpop.permute.xlu1 %1731  ;;  %v1726_v43 = vpop.permute.xlu0 %1725 }
 0x9f7   : > { %v1737_v11 = vsel %vm1735_vm9, %v1726_v43, %v1732_v42 }
 0x9fa   : > { %v1713_v44 = vpop.permute.xlu1 %1712  ;;  %v1707_v45 = vpop.permute.xlu0 %1706 }
 0x9fb   : > { %v1718_v30 = vsel %vm1716_vm5, %v1707_v45, %v1713_v44 }
 0x9fe   : > { %v1808_v47 = vpop.permute.xlu1 %1807  ;;  %v1802_v29 = vpop.permute.xlu0 %1801 }
 0x9ff   : > { %v1814_v48 = vsel %vm1813_vm7, %v1802_v29, %v1808_v47  ;;  %vm1699_vm7 = vmand %vm1697_vm1, %vm1698_vm8 }
 0xa00   : > { %2432 = vmatpush1.msk.msra.mxu0 %vm1795_vm15, %v1814_v48 }
 0xa01   : > { %1856 = vmatprep.subr.mxu0 %v3072_v3 }
 0xa02   : > { %v1787_v50 = vpop.permute.xlu1 %1786  ;;  %2433 = vmatpush1.msk.msra.mxu0 %vm1796_vm13, %v1794_v49  ;;  %v1781_v46 = vpop.permute.xlu0 %1780 }
 0xa03   : > { %v1793_v51 = vsel %vm1792_vm10, %v1781_v46, %v1787_v50  ;;  %1858 = vmatprep.subr.mxu0 %v3072_v3  ;;  %vm1832_vm10 = vcmask 89088  }
 0xa04   : > { %2434 = vmatpush1.msk.msra.mxu0 %vm1796_vm13, %v1793_v51  ;;  %vm4419_vm13 = vcmask 1040384  }
 0xa05   : > { %1860 = vmatprep.subr.mxu0 %v3072_v3 }
 0xa06   : > { %v1769_v54 = vpop.permute.xlu1 %1768  ;;  %2435 = vmatpush1.msk.msra.mxu0 %vm1738_vm14, %v1775_v52  ;;  %v1763_v56 = vpop.permute.xlu0 %1762 }
 0xa07   : > { %v1774_v58 = vsel %vm4416_vm4, %v1763_v56, %v1769_v54  ;;  %1862 = vmatprep.subr.mxu0 %v3072_v3 }
 0xa08   : > { %2436 = vmatpush1.msk.msra.mxu0 %vm1738_vm14, %v1774_v58 }
 0xa09   : > { %1864 = vmatprep.subr.mxu0 %v3072_v3 }
 0xa0a   : > { %v1691_v60 = vpop.permute.xlu1 %1690  ;;  %1865 = vmatpush1.msra.mxu0 %v4009_v31  ;;  %v1685_v53 = vpop.permute.xlu0 %1684 }
 0xa0b   : > { %1866 = vmatprep.subr.mxu0 %v3072_v3  ;;  %v1696_v20 = vsel %vm1694_vm6, %v1685_v53, %v1691_v60 }
 0xa0c   : > { %1867 = vmatpush1.msra.mxu0 %v4027_v16 }
 0xa0d   : > { %1868 = vmatprep.subr.mxu0 %v3072_v3 }
 0xa0e   : > { %v1751_v1 = vpop.permute.xlu1 %1750  ;;  %2437 = vmatpush1.msk.msra.mxu0 %vm1698_vm8, %v1757_v62  ;;  %v1745_v7 = vpop.permute.xlu0 %1744 }
 0xa0f   : > { %v1756_v9 = vsel %vm4418_vm3, %v1745_v7, %v1751_v1  ;;  %1870 = vmatprep.subr.mxu0 %v3072_v3 }
 0xa10   : > { %2438 = vmatpush1.msk.msra.mxu0 %vm1698_vm8, %v1756_v9  ;;  %vm1835_vm8 = vmand %vm1795_vm15, %vm1738_vm14 }
 0xa11   : > { %1872 = vmatprep.subr.mxu0 %v3072_v3 }
 0xa12   : > { %v1730_v6 = vpop.permute.xlu1 %1729  ;;  %2439 = vmatpush1.msk.msra.mxu0 %vm1739_vm12, %v1737_v11  ;;  %v1724_v13 = vpop.permute.xlu0 %1723 }
 0xa13   : > { %v1736_v14 = vsel %vm1735_vm9, %v1724_v13, %v1730_v6  ;;  %1874 = vmatprep.subr.mxu0 %v3072_v3 }
 0xa14   : > { %2440 = vmatpush1.msk.msra.mxu0 %vm1739_vm12, %v1736_v14 }
 0xa15   : > { %1876 = vmatprep.subr.mxu0 %v3072_v3 }
 0xa16   : > { %v1711_v17 = vpop.permute.xlu1 %1710  ;;  %2441 = vmatpush1.msk.msra.mxu0 %vm1697_vm1, %v1718_v30  ;;  %v1705_v18 = vpop.permute.xlu0 %1704 }
 0xa17   : > { %v1717_v19 = vsel %vm1716_vm5, %v1705_v18, %v1711_v17  ;;  %1878 = vmatprep.subr.mxu0 %v3072_v3 }
 0xa18   : > { %2442 = vmatpush1.msk.msra.mxu0 %vm1697_vm1, %v1717_v19 }
 0xa19   : > { %1880 = vmatprep.subr.mxu0 %v3072_v3 }
 0xa1a   : > { %v1689_v15 = vpop.permute.xlu1 %1688  ;;  %2443 = vmatpush1.msk.msra.mxu0 %vm1699_vm7, %v1696_v20  ;;  %v1683_v21 = vpop.permute.xlu0 %1682 }
 0xa1b   : > { %v1695_v55 = vsel %vm1694_vm6, %v1683_v21, %v1689_v15  ;;  %1882 = vmatprep.subr.mxu0 %v3072_v3 }
 0xa1c   : > { %2444 = vmatpush1.msk.msra.mxu0 %vm1699_vm7, %v1695_v55 }
 0xa1d   : > { %1910 = vmatprep.subr.mxu0 %v3072_v3 }
 0xa1e   : > { %v1829_v57 = vpop.permute.xlu1 %1828  ;;  %2445 = vmatpush2.msk.msra.mxu0 %vm4419_vm13, %v3066_v0  ;;  %v1823_v59 = vpop.permute.xlu0 %1822  ;;  %v1674_v0 = vld [vmem:[#allocation11 + $0x10] sm:$0xff] }
 0xa1f   : > { %v1834_v61 = vsel %vm1832_vm10, %v1823_v59, %v1829_v57  ;;  %1912 = vmatprep.subr.mxu0 %v3072_v3 }
 0xa20   : > { %2446 = vmatpush2.msk.msra.mxu0 %vm1835_vm8, %v1834_v61 }
 0xa21   : > { %1914 = vmatprep.subr.mxu0 %v3072_v3  ;;  %v1676_v3 = vld [vmem:[#allocation11 + $0x20] sm:$0xff] }
 0xa22   : > { %v1827_v63 = vpop.permute.xlu1 %1826  ;;  %v1821_v2 = vpop.permute.xlu0 %1820 }
 0xa23   : > { %v1833_v32 = vsel %vm1832_vm10, %v1821_v2, %v1827_v63 }
 0xa24   : > { %2447 = vmatpush2.msk.msra.mxu0 %vm1835_vm8, %v1833_v32 }
 0xa25   : > { %1917 = vmatmul.mubr.f32.vlgmr.msra.gmra.mxu0 %v1672_v8 }
 0xa26   : > { %2449 = vmatprep.mubr.msk.f32.mxu0 %vm500_vm11, %v1675_v12 }
 0xa29   : > { %1922 = vmatmul.mubr.f32.gmra.mxu0 %v1674_v0 }
 0xa2a   : > { %2450 = vmatprep.mubr.msk.f32.mxu0 %vm500_vm11, %v1677_v5 }
 0xa2d   : > { %1927 = vmatmul.mubr.f32.gmra.mxu0 %v1676_v3 }
 0xa2e   : > { %2451 = vmatprep.mubr.msk.f32.mxu0 %vm500_vm11, %v1679_v22 }
 0xa31   : > { %1932 = vmatmul.mubr.f32.gmra.mxu0 %v1678_v23 }
 0xa32   : > { %2905 = shalt.err (!%p2902_p1)
}
 0xa33   : > { %s2906_s3 = scalar_lea.hbm %s1988_s27, 256  ;;  %s2910_s21 = scalar_lea.hbm %s4277_s7, 512 }
 0xa34   : > { %p2907_p3 = scmp.ne.s32.totalorder %s1988_s27, %s2906_s3  ;;  %p2911_p6 = scmp.lt.s32.totalorder %s1988_s27, %s4277_s7 }
 0xa35   : > { %p2912_p5 = scmp.lt.s32.totalorder %s2910_s21, %s2906_s3 }
 0xa36   : > { %p2908_p4 = pnand %p2907_p3, %p4420_p10 }
 0xa37   : > { %p2913_p7 = por %p2912_p5, %p2911_p6 }
 0xa38   : > { %p2909_p12 = pneg %p2908_p4 }
 0xa3a   : > { %p2914_p8 = pnand %p2913_p7, %p2909_p12 }
 0xa3c   : > { %2917 = shalt.err (!%p2914_p8)
}
 0xa3d   : > { %2594 = dma.vmem_to_hbm [thread:$0]  (%p4420_p10), %s4127_s14, 256, %s1988_s27, %s4141_s17  }
 0xa3e   : > { %s4164_s18 = scalar_lea.hbm %s4278_s8, %s4135_s5  ;;  %s1974_s3 = scalar_lea.hbm %s4276_s6, %s4135_s5 }
 0xa3f   : > { %s1942_s11 = scalar_lea.sflag [#allocation4], %s3317_s2  ;;  %s2918_s23 = scalar_lea.vmem %s4125_s0, 256 }
 0xa40   : > { %p2919_p13 = scmp.ne.s32.totalorder %s4125_s0, %s2918_s23  ;;  %s3103_s21 = smov [#allocation13]  }
 0xa41   : > { %s2922_s4 = sshll.u32 %s3103_s21, 4  ;;  %s2923_s4 = int_to_ptr.vmem [resolvable:$false] %s2922_s4 }
 0xa42   : > { %p2920_p0 = pnand %p2919_p13, %p4420_p10  ;;  %s2924_s20 = scalar_lea.vmem %s2923_s4, 512 }
 0xa43   : > { %p2925_p9 = scmp.lt.s32.totalorder %s4125_s0, %s2923_s4  ;;  %p2926_p11 = scmp.lt.s32.totalorder %s2924_s20, %s2918_s23 }
 0xa44   : > { %p2921_p2 = pneg %p2920_p0 }
 0xa45   : > { %p2927_p1 = por %p2926_p11, %p2925_p9 }
 0xa47   : > { %p2928_p3 = pnand %p2927_p1, %p2921_p2 }
 0xa49   : > { %2931 = shalt.err (!%p2928_p3)
}
 0xa4a   : > { %s2932_s14 = scalar_lea.hbm %s1974_s3, 256  ;;  %s2936_s28 = scalar_lea.hbm %s4276_s6, 512 }
 0xa4b   : > { %p2933_p4 = scmp.ne.s32.totalorder %s1974_s3, %s2932_s14  ;;  %p2937_p5 = scmp.lt.s32.totalorder %s1974_s3, %s4276_s6 }
 0xa4c   : > { %p2938_p7 = scmp.lt.s32.totalorder %s2936_s28, %s2932_s14 }
 0xa4d   : > { %p2934_p12 = pnand %p2933_p4, %p4420_p10 }
 0xa4e   : > { %p2939_p8 = por %p2938_p7, %p2937_p5 }
 0xa4f   : > { %p2935_p6 = pneg %p2934_p12 }
 0xa51   : > { %p2940_p13 = pnand %p2939_p8, %p2935_p6 }
 0xa53   : > { %2943 = shalt.err (!%p2940_p13)
}
 0xa54   : > { %2593 = dma.vmem_to_hbm [thread:$0]  (%p4420_p10), %s4125_s0, 256, %s1974_s3, %s1942_s11  }
 0xa55   : > { %s2944_s23 = scalar_lea.vmem %s4129_s15, 256  ;;  %s3104_s21 = smov [#allocation16]  }
 0xa56   : > { %p2945_p0 = scmp.ne.s32.totalorder %s4129_s15, %s2944_s23  ;;  %s2948_s4 = sshll.u32 %s3104_s21, 4  ;;  %s2949_s4 = int_to_ptr.vmem [resolvable:$false] %s2948_s4 }
 0xa57   : > { %s2950_s20 = scalar_lea.vmem %s2949_s4, 512  ;;  %p2951_p11 = scmp.lt.s32.totalorder %s4129_s15, %s2949_s4 }
 0xa58   : > { %p2946_p2 = pnand %p2945_p0, %p4420_p10  ;;  %p2952_p1 = scmp.lt.s32.totalorder %s2950_s20, %s2944_s23 }
 0xa5a   : > { %p2947_p9 = pneg %p2946_p2  ;;  %p2953_p3 = por %p2952_p1, %p2951_p11 }
 0xa5c   : > { %p2954_p4 = pnand %p2953_p3, %p2947_p9 }
 0xa5e   : > { %2957 = shalt.err (!%p2954_p4)
}
 0xa5f   : > { %s2958_s14 = scalar_lea.hbm %s4164_s18, 256  ;;  %s2962_s11 = scalar_lea.hbm %s4278_s8, 512 }
 0xa60   : > { %p2959_p12 = scmp.ne.s32.totalorder %s4164_s18, %s2958_s14  ;;  %p2963_p7 = scmp.lt.s32.totalorder %s4164_s18, %s4278_s8 }
 0xa61   : > { %p2964_p8 = scmp.lt.s32.totalorder %s2962_s11, %s2958_s14 }
 0xa62   : > { %p2960_p6 = pnand %p2959_p12, %p4420_p10 }
 0xa63   : > { %p2965_p13 = por %p2964_p8, %p2963_p7 }
 0xa64   : > { %p2961_p5 = pneg %p2960_p6 }
 0xa66   : > { %p2966_p0 = pnand %p2965_p13, %p2961_p5 }
 0xa68   : > { %2969 = shalt.err (!%p2966_p0)
}
 0xa69   : > { %s3105_s28 = smov 128   ;;  %s4215_s23 = scalar_lea.hbm %s4279_s9, %s4135_s5 }
 0xa6a   : > { %2595 = dma.vmem_to_hbm [thread:$0]  (%p4420_p10), %s4129_s15, 256, %s4164_s18, %s4141_s17, %s3105_s28, %s3105_s28, %s4400_s12  }
 0xa6b   : > { %s1957_s21 = scalar_lea.sflag [#allocation18], %s3317_s2  ;;  %s2970_s4 = scalar_lea.vmem %s4131_s29, 256 }
 0xa6c   : > { %p2971_p2 = scmp.ne.s32.totalorder %s4131_s29, %s2970_s4  ;;  %s3106_s20 = smov [#allocation17]  }
 0xa6d   : > { %s2974_s14 = sshll.u32 %s3106_s20, 4  ;;  %s2975_s14 = int_to_ptr.vmem [resolvable:$false] %s2974_s14 }
 0xa6e   : > { %p2972_p9 = pnand %p2971_p2, %p4420_p10  ;;  %s2976_s0 = scalar_lea.vmem %s2975_s14, 512 }
 0xa6f   : > { %p2977_p1 = scmp.lt.s32.totalorder %s4131_s29, %s2975_s14  ;;  %p2978_p3 = scmp.lt.s32.totalorder %s2976_s0, %s2970_s4 }
 0xa70   : > { %p2973_p11 = pneg %p2972_p9 }
 0xa71   : > { %p2979_p4 = por %p2978_p3, %p2977_p1 }
 0xa73   : > { %p2980_p12 = pnand %p2979_p4, %p2973_p11 }
 0xa75   : > { %2983 = shalt.err (!%p2980_p12)
}
 0xa76   : > { %s2984_s15 = scalar_lea.hbm %s4215_s23, 256  ;;  %s2988_s17 = scalar_lea.hbm %s4279_s9, 512 }
 0xa77   : > { %p2985_p6 = scmp.ne.s32.totalorder %s4215_s23, %s2984_s15  ;;  %p2989_p8 = scmp.lt.s32.totalorder %s4215_s23, %s4279_s9 }
 0xa78   : > { %p2990_p13 = scmp.lt.s32.totalorder %s2988_s17, %s2984_s15 }
 0xa79   : > { %p2986_p5 = pnand %p2985_p6, %p4420_p10 }
 0xa7a   : > { %p2991_p0 = por %p2990_p13, %p2989_p8 }
 0xa7b   : > { %p2987_p7 = pneg %p2986_p5 }
 0xa7d   : > { %p2992_p2 = pnand %p2991_p0, %p2987_p7 }
 0xa7f   : > { %2995 = shalt.err (!%p2992_p2)
}
 0xa80   : > { %2596 = dma.vmem_to_hbm [thread:$0]  (%p4420_p10), %s4131_s29, 256, %s4215_s23, %s1957_s21, %s3105_s28, %s3105_s28, %s4400_s12   ;;  %vm4421_vm11 = vcmask 130048  }
 0xa81   : > { %p480_p9 = scmp.lt.s32.totalorder %s3183_s19, 1  ;;  %vm4422_vm15 = vmmov %vm4421_vm11 }
 0xa82   : > { %vm4423_vm14 = vmmov %vm4421_vm11 }
 0xa83   : > { %s4433_s19 = smov (!%p480_p9, %s3183_s19), 1  ;;  %vm4424_vm0 = vmmov %vm4421_vm11 }
 0xa84   : > { %s2467_s11 = sshll.u32 %s4433_s19, 5 }
 0xa85   : > { %s484_s1 = scalar_lea.vmem %s4280_s10, %s2467_s11 }
 0xae5   : > { %v1918_v24 = vpop.f32.mrf.mxu0 }
 0xae6   : > { %1937 = vst.msk [vmem:[%s484_s1] sm:$0xff] %vm4421_vm11, %v1918_v24 }
 0xae7   : > { %v1920_v25 = vpop.f32.mrf.mxu0 }
 0xae9   : > { %v1923_v26 = vpop.f32.mrf.mxu0 }
 0xaea   : > { %1938 = vst.msk [vmem:[%s484_s1 + $0x8] sm:$0xff] %vm4422_vm15, %v1923_v26 }
 0xaeb   : > { %v1925_v10 = vpop.f32.mrf.mxu0 }
 0xaed   : > { %v1928_v27 = vpop.f32.mrf.mxu0 }
 0xaee   : > { %1939 = vst.msk [vmem:[%s484_s1 + $0x10] sm:$0xff] %vm4423_vm14, %v1928_v27 }
 0xaef   : > { %v1930_v28 = vpop.f32.mrf.mxu0 }
 0xaf1   : > { %v1933_v31 = vpop.f32.mrf.mxu0 }
 0xaf2   : > { %1940 = vst.msk [vmem:[%s484_s1 + $0x18] sm:$0xff] %vm4424_vm0, %v1933_v31 }
 0xaf3   : > { %v1935_v16 = vpop.f32.mrf.mxu0 }
 0xaf4 PF: > { %s2037_s19 = sand.u32 1, %s3042_s13   ;;  %p4425_p10 = scmp.ne.s32.totalorder %s4345_s25, 0 }
 0xaf5   : > { %p4426_p11 = scmp.ge.s32.totalorder %s3054_s16, 2  ;;  %s2038_s30 = scalar_lea.sflag [#allocation4], %s2037_s19 }
 0xaf7   : > { %p2622_p1 = pnand %p4426_p11, %p4425_p10 }
 0xaf9   : > { %p2623_p3 = pneg %p2622_p1 }
 0xafb   : > { %3029 = dma.done.wait (%p2623_p3), %s2038_s30, 256  }
 0xafc   : > { %3031 = vsyncadd (%p2623_p3), %s2038_s30, 4294967040  ;;  %s4427_s12 = sadd.s32 4294967294, %s3054_s16  }
 0xafd   : > { %s2046_s29 = sand.u32 1, %s4427_s12  }
 0xafe   : > { %s2047_s28 = scalar_lea.sflag [#allocation15], %s2046_s29 }
 0xaff   : > { %3033 = dma.done.wait (%p2623_p3), %s2047_s28, 512  }
 0xb00   : > { %3035 = vsyncadd (%p2623_p3), %s2047_s28, 4294966784  ;;  %s2065_s22 = scalar_lea.sflag [#allocation18], %s2037_s19 }
 0xb01   : > { %3037 = dma.done.wait (%p2623_p3), %s2065_s22, 256  }
 0xb02   : > { %3039 = vsyncadd (%p2623_p3), %s2065_s22, 4294967040  ;;  %s4428_s13 = sld [smem:[#allocation26_spill]]  ;;  %p33_p4 = scmp.ge.s32.totalorder %s3258_s26, 4  }
 0xb03   : > { %s4429_s14 = sld [smem:[#allocation27_spill]]  ;;  %s4431_s16 = smov %s3258_s26 }
 0xb04   : > { %s4430_s15 = sld [smem:[#allocation28_spill]]  ;;  %35 = sbr.rel (!%p33_p4) target bundleno = 19 (0x13), region = 170 }
 0xb09   :  { %2078 = vsyncpa [#allocation3], 1 }
 0xb0a   :  { %2080 = vsyncpa [#allocation3 + $0x1], 1 }
 0xb0b   :  { %2081 = vsyncpa [#allocation6], 1 }
 0xb0c   :  { %2082 = vsyncpa [#allocation9], 1 }
 0xb0d   :  { %2083 = vsyncpa [#allocation12], 1 }
 0xb0e   :  { %2084 = vsyncpa [#allocation4], 1 }
 0xb0f   :  { %2086 = vsyncpa [#allocation4 + $0x1], 1 }
 0xb10   :  { %2087 = vsyncpa [#allocation15], 1 }
 0xb11   :  { %2089 = vsyncpa [#allocation15 + $0x1], 1 }
 0xb12   :  { %2090 = vsyncpa [#allocation18], 1 }
 0xb13   :  { %2092 = vsyncpa [#allocation18 + $0x1], 1 }

</bundles_post_ra>
